<compile_context>
chip_gen: v7x
topology: tpu7x:2x2x1
jax: 0.10.0
libtpu: 0.0.40
codegen_flags: <defaults>
</compile_context>

<pallas_src>
import math
import functools

import jax
import jax.numpy as jnp
from jax.experimental import pallas as pl
from jax.experimental.pallas import tpu as pltpu


def _round_up(x, m):
    return ((x + m - 1) // m) * m


def _pick_tile_n(flatten, max_tile=32768):
    """Lane-dense (multiple-of-128) output tile width.

    Large enough to amortize per-grid-step overhead, small enough that
    double-buffered weight/bias/output tiles fit comfortably even in v7x's
    64 MiB VMEM, and capped at ~half the feature axis so the 'parallel' grid
    axis keeps >= 2 steps (both v7x TensorCores stay busy).
    """
    half = _round_up(pl.cdiv(flatten, 2), 128)
    return max(128, min(max_tile, half))


# ----------------------------------------------------------------------------
# Pallas kernel: fused Linear + Sigmoid over one lane-dense output tile
# ----------------------------------------------------------------------------

def _dense_sigmoid_kernel(z_ref, w_ref, b_ref, o_ref):
    """o = sigmoid(z @ w + b) for one (B, TILE_N) output tile.

    z: (B, Z) bf16 (tiny, resident), w: (Z, TILE_N) bf16 (streamed),
    b: (1, TILE_N) f32, o: (B, TILE_N) f32.  MXU accumulates in f32.
    """
    y = jnp.dot(z_ref[...], w_ref[...], preferred_element_type=jnp.float32)
    y = y + b_ref[...]
    # sigmoid(y) == 0.5*tanh(0.5*y) + 0.5  -> one EUP push per element.
    o_ref[...] = 0.5 * jnp.tanh(0.5 * y) + 0.5


def dense_sigmoid(z_bf16, w_bf16, b, *, tile_n):
    """z_bf16: (B,Z) bf16, w_bf16: (Z,F) bf16, b: (1,F) f32 -> (B,F) f32."""
    B, Z = z_bf16.shape
    Zw, flatten = w_bf16.shape
    assert Zw == Z
    assert b.shape == (1, flatten)
    assert tile_n % 128 == 0
    grid_n = pl.cdiv(flatten, tile_n)        # ragged final block is masked

    cost = pl.CostEstimate(
        flops=2 * B * Z * flatten,
        transcendentals=B * flatten,
        bytes_accessed=(Z * flatten * 2      # bf16 weight stream
                        + flatten * 4        # f32 bias
                        + B * Z * 2          # bf16 activations
                        + B * flatten * 4),  # f32 output writeback
    )

    return pl.pallas_call(
        _dense_sigmoid_kernel,
        out_shape=jax.ShapeDtypeStruct((B, flatten), jnp.float32),
        grid_spec=pltpu.PrefetchScalarGridSpec(
            num_scalar_prefetch=0,
            grid=(grid_n,),
            in_specs=[
                pl.BlockSpec((B, Z), lambda j: (0, 0)),        # z: resident
                pl.BlockSpec((Z, tile_n), lambda j: (0, j)),   # weight tile
                pl.BlockSpec((1, tile_n), lambda j: (0, j)),   # bias tile
            ],
            out_specs=pl.BlockSpec((B, tile_n), lambda j: (0, j)),
        ),
        compiler_params=pltpu.CompilerParams(
            dimension_semantics=("parallel",)),
        cost_estimate=cost,
    )(z_bf16, w_bf16, b)


# ----------------------------------------------------------------------------
# Parameters (PyTorch-style uniform init for nn.Linear)
# ----------------------------------------------------------------------------

def make_params(key, z_dim, filter_size, n_frames=861):
    """Returns (params_for_kernel, (w_f32, b_f32) reference weights)."""
    flatten = filter_size * n_frames
    bound = 1.0 / math.sqrt(z_dim)
    kw, kb = jax.random.split(key)
    # Stored (in, out); a PyTorch nn.Linear checkpoint is (out, in) and must
    # be transposed when importing.
    w = jax.random.uniform(kw, (z_dim, flatten), jnp.float32, -bound, bound)
    b = jax.random.uniform(kb, (1, flatten), jnp.float32, -bound, bound)
    params = dict(
        w=w.astype(jnp.bfloat16),   # bf16 HBM weight stream, f32 MXU accum
        b=b,
    )
    return params, (w, b)


# ----------------------------------------------------------------------------
# Full forward pass (decode == forward for this module)
# ----------------------------------------------------------------------------

@functools.partial(jax.jit, static_argnames=("filter_size", "n_frames", "tile_n"))
def mag_spec_decoder_forward(z, w_bf16, b, *, filter_size, n_frames=861,
                             tile_n=None):
    """z: (B, z_dim) f32 -> (B, filter_size, n_frames) f32 magnitude spec."""
    B = z.shape[0]
    flatten = filter_size * n_frames
    assert w_bf16.shape[1] == flatten and b.shape == (1, flatten)
    if tile_n is None:
        tile_n = _pick_tile_n(flatten)
    # Cast z once here (not per grid step inside the kernel).
    h = dense_sigmoid(z.astype(jnp.bfloat16), w_bf16, b, tile_n=tile_n)
    # Row-major reshape matches PyTorch's h.reshape(B, filter_size, 861).
    return h.reshape(B, filter_size, n_frames)


if __name__ == "__main__":
    # Small shapes consistent with the module: the 861 time frames are
    # hard-coded in MagSpecDecoder; l_grain chosen small for the test.
    B = 2
    Z_DIM = 16
    L_GRAIN = 64
    FILTER_SIZE = L_GRAIN // 2 + 1        # 33
    N_FRAMES = 861                        # hard-coded in MagSpecDecoder

    key = jax.random.PRNGKey(0)
    kz, kp = jax.random.split(key)
    z = jax.random.normal(kz, (B, Z_DIM), jnp.float32)
    params, (w_ref, b_ref) = make_params(kp, Z_DIM, FILTER_SIZE, N_FRAMES)

    out = mag_spec_decoder_forward(z, params["w"], params["b"],
                                   filter_size=FILTER_SIZE, n_frames=N_FRAMES)
    out = jax.block_until_ready(out)

    # Reference (pure f32) check of the fused Linear + Sigmoid + reshape.
    ref = jax.nn.sigmoid(z @ w_ref + b_ref).reshape(B, FILTER_SIZE, N_FRAMES)

    assert out.shape == (B, FILTER_SIZE, N_FRAMES), out.shape
    assert bool(jnp.all(jnp.isfinite(out)))
    assert bool(jnp.all((out >= 0.0) & (out <= 1.0)))        # sigmoid range
    max_err = float(jnp.max(jnp.abs(out - ref)))
    assert max_err < 2e-2, max_err                           # bf16 operand rounding
    print("KERNEL_OK")
</pallas_src>

<mosaic_0001>
module attributes {stable_mosaic.version = 11 : i64} {
  func.func @_dense_sigmoid_kernel(%arg0: i32, %arg1: memref<2x16xbf16, #tpu.memory_space<vmem>>, %arg2: memref<16x14208xbf16, #tpu.memory_space<vmem>>, %arg3: memref<1x14208xf32, #tpu.memory_space<vmem>>, %arg4: memref<2x14208xf32, #tpu.memory_space<vmem>>) attributes {dimension_semantics = [#tpu.dimension_semantics<parallel>], iteration_bounds = array<i64: 2>, scalar_prefetch = 0 : i64, scratch_operands = 0 : i64, tpu.core_type = #tpu.core_type<tc>, window_params = [{pipeline_mode = #tpu.pipeline_mode<synchronous>, transform_indices = @transform_0, window_bounds = array<i64: 2, 16>}, {transform_indices = @transform_1, window_bounds = array<i64: 16, 14208>}, {transform_indices = @transform_2, window_bounds = array<i64: 1, 14208>}, {transform_indices = @transform_3, window_bounds = array<i64: 2, 14208>}]} {
    %c0 = arith.constant 0 : index
    %c0_0 = arith.constant 0 : index
    %0 = vector.load %arg1[%c0, %c0_0] : memref<2x16xbf16, #tpu.memory_space<vmem>>, vector<2x16xbf16>
    %c0_1 = arith.constant 0 : index
    %c0_2 = arith.constant 0 : index
    %1 = vector.load %arg2[%c0_1, %c0_2] : memref<16x14208xbf16, #tpu.memory_space<vmem>>, vector<16x14208xbf16>
    %cst = arith.constant dense<0.000000e+00> : vector<2x14208xf32>
    %2 = tpu.matmul %0, %1, %cst {dimension_numbers = #tpu.dot_dimension_numbers<[1], [0], [0], [1], [0, 0, 1, 1], [], []>} : vector<2x16xbf16>, vector<16x14208xbf16>, vector<2x14208xf32> -> vector<2x14208xf32>
    %c0_3 = arith.constant 0 : index
    %c0_4 = arith.constant 0 : index
    %3 = vector.load %arg3[%c0_3, %c0_4] : memref<1x14208xf32, #tpu.memory_space<vmem>>, vector<1x14208xf32>
    %4 = vector.broadcast %3 : vector<1x14208xf32> to vector<2x14208xf32>
    %5 = arith.addf %2, %4 : vector<2x14208xf32>
    %cst_5 = arith.constant 5.000000e-01 : f32
    %6 = vector.broadcast %cst_5 : f32 to vector<2x14208xf32>
    %7 = arith.mulf %6, %5 : vector<2x14208xf32>
    %8 = math.tanh %7 : vector<2x14208xf32>
    %cst_6 = arith.constant 5.000000e-01 : f32
    %9 = vector.broadcast %cst_6 : f32 to vector<2x14208xf32>
    %10 = arith.mulf %9, %8 : vector<2x14208xf32>
    %cst_7 = arith.constant 5.000000e-01 : f32
    %11 = vector.broadcast %cst_7 : f32 to vector<2x14208xf32>
    %12 = arith.addf %10, %11 : vector<2x14208xf32>
    %c0_8 = arith.constant 0 : index
    %c0_9 = arith.constant 0 : index
    %13 = vector.load %arg4[%c0_8, %c0_9] : memref<2x14208xf32, #tpu.memory_space<vmem>>, vector<2x14208xf32>
    tpu.vector_store %arg4[%c0_8, %c0_9], %12 {strides = array<i32>} : memref<2x14208xf32, #tpu.memory_space<vmem>>, vector<2x14208xf32>,
    return
  }
  func.func @transform_0(%arg0: i32) -> (i32, i32) {
    %c0_i32 = arith.constant 0 : i32
    %c0_i32_0 = arith.constant 0 : i32
    %c0_i32_1 = arith.constant 0 : i32
    return %c0_i32, %c0_i32_0 : i32, i32
  }
  func.func @transform_1(%arg0: i32) -> (i32, i32) {
    %c0_i32 = arith.constant 0 : i32
    %c0_i32_0 = arith.constant 0 : i32
    return %c0_i32, %arg0 : i32, i32
  }
  func.func @transform_2(%arg0: i32) -> (i32, i32) {
    %c0_i32 = arith.constant 0 : i32
    %c0_i32_0 = arith.constant 0 : i32
    return %c0_i32, %arg0 : i32, i32
  }
  func.func @transform_3(%arg0: i32) -> (i32, i32) {
    %c0_i32 = arith.constant 0 : i32
    %c0_i32_0 = arith.constant 0 : i32
    return %c0_i32, %arg0 : i32, i32
  }
}

</mosaic_0001>

<bundles_post_ra>
// kernel: mag_spec_decoder_forward.1
= control target key start
LH: loop header
LB: loop body
LE: loop exit
PB: predicated region body
PF: predicated region fallthrough
CT: control target
= control target key end

     0   :  { %8 = vsyncpa [#allocation3], 0  ;;  %s6529_s0 = inlined_call_operand.vmem [shape: bf16[2,16], index: 0, kind: input, shape index: {}]   ;;  %s6530_s1 = inlined_call_operand.hbm [shape: bf16[16,28413], index: 1, kind: input, shape index: {}]   ;;  %s6531_s2 = inlined_call_operand.hbm [shape: f32[1,28413], index: 2, kind: input, shape index: {}]   ;;  %s6532_s3 = inlined_call_operand.vmem [shape: f32[2,28413], index: 3, kind: output, shape index: {}]  }
   0x1   :  { %10 = vsyncpa [#allocation3 + $0x1], 0 }
   0x2   :  { %11 = vsyncpa [#allocation5], 0 }
   0x3   :  { %13 = vsyncpa [#allocation5 + $0x1], 0  ;;  %s5719_s12 = smov 0   ;;  %s5721_s13 = smov 0  }
   0x4   :  { %s5723_s14 = smov 0   ;;  %s5725_s15 = smov 0  }
   0x5 LB: > { %s4960_s16 = sadd.s32 4294967295, %s5688_s15   ;;  %s5739_s17 = sadd.s32 1, %s5688_s15   ;;  %s5688_s15 = sphi %s5725_s15, %s6542_s15   ;;  %s5684_s14 = sphi %s5723_s14, %s6541_s14   ;;  %s5680_s13 = sphi %s5721_s13, %s6540_s13   ;;  %s5676_s12 = sphi %s5719_s12, %s6539_s12  }
   0x6   : > { %s44_s18 = ssub.s32 %s5688_s15, %s5739_s17  ;;  %s47_s19 = sadd.s32 1, %s5684_s14 }
   0x7   : > { %p45_p0 = scmp.eq.s32.totalorder %s44_s18, 0  ;;  %p54_p1 = scmp.ne.s32.totalorder %s5684_s14, %s5680_s13 }
   0x8   : > { %p55_p2 = scmp.eq.s32.totalorder %s5688_s15, 0  ;;  %p60_p3 = scmp.ne.s32.totalorder %s5680_s13, %s5676_s12 }
   0x9   : > { %s5749_s20 = scalar_select %p45_p0, %s5684_s14, %s47_s19  }
   0xa   : > { %p56_p4 = por %p55_p2, %p54_p1  ;;  %p61_p5 = scmp.eq.s32.totalorder %s4960_s16, 0 }
   0xb   : > { %p5162_p6 = scmp.lt.s32.totalorder %s5688_s15, 2  ;;  %s5759_s22 = sand.u32 1, %s5684_s14  }
   0xc   : > { %p5754_p7 = por %p61_p5, %p60_p3  ;;  %s5147_s23 = smul.u32 888, %s5759_s22 }
   0xd   : > { %s5137_s24 = smul.u32 7104, %s5688_s15  ;;  %p5763_p8 = pnand %p5162_p6, %p56_p4 }
   0xe   : > { %s6534_s21 = scalar_select %p5754_p7, 1, 0 }
   0xf   : > { %s5770_s28 = scalar_lea.hbm %s6530_s1, %s5137_s24  ;;  %s143_s29 = scalar_lea.vmem [#allocation2], %s5147_s23 }
  0x10   : > { %s150_s30 = sshll.u32 %s143_s29, 4  ;;  %s140_s4 = scalar_lea.sflag [#allocation3], %s5759_s22  ;;  %s5772_s30 = int_to_ptr.vmem [resolvable:$true] %s150_s30 }
  0x11   : > { %s5590_s5 = scalar_lea.hbm %s5770_s28, 14208  ;;  %p5592_p10 = pneg %p5763_p8 }
  0x12   : > { %p5591_p9 = scmp.ne.s32.totalorder %s5770_s28, %s5590_s5  ;;  %s5595_s8 = scalar_lea.hbm %s6530_s1, 28416 }
  0x13   : > { %p5596_p13 = scmp.lt.u32.totalorder %s5770_s28, %s6530_s1  ;;  %p5597_p0 = scmp.lt.u32.totalorder %s5595_s8, %s5590_s5 }
  0x14   : > { %p5593_p11 = pnand %p5592_p10, %p5591_p9  ;;  %p5599_p2 = scmp.lt.u32.totalorder %s5590_s5, %s5770_s28 }
  0x15   : > { %p5598_p1 = por %p5597_p0, %p5596_p13 }
  0x16   : > { %p5594_p12 = pneg %p5593_p11 }
  0x17   : > { %p5600_p3 = por %p5599_p2, %p5598_p1 }
  0x19   : > { %p5601_p4 = pnand %p5600_p3, %p5594_p12 }
  0x1b   : > { %5604 = shalt.err (!%p5601_p4)
}
  0x1c   : > { %s5605_s11 = scalar_lea.vmem %s5772_s30, 14208  ;;  %s5690_s12 = smov [#allocation2]  }
  0x1d   : > { %p5606_p5 = scmp.ne.s32.totalorder %s5772_s30, %s5605_s11  ;;  %s5610_s18 = sshll.u32 %s5690_s12, 4  ;;  %s5611_s18 = int_to_ptr.vmem [resolvable:$false] %s5610_s18 }
  0x1e   : > { %s5612_s19 = scalar_lea.vmem %s5611_s18, 28416  ;;  %p5613_p11 = scmp.lt.s32.totalorder %s5772_s30, %s5611_s18 }
  0x1f   : > { %p5608_p6 = pnand %p5606_p5, %p5592_p10  ;;  %p5614_p13 = scmp.lt.s32.totalorder %s5612_s19, %s5605_s11 }
  0x21   : > { %p5609_p9 = pneg %p5608_p6  ;;  %p5615_p0 = por %p5614_p13, %p5613_p11 }
  0x23   : > { %p5616_p1 = pnand %p5615_p0, %p5609_p9 }
  0x25   : > { %5619 = shalt.err (!%p5616_p1)
}
  0x26   : > { %s5691_s23 = smov 14208   ;;  %s5692_s24 = smov 7104  }
  0x27   : > { %s5693_s26 = smov 444   ;;  %p4966_p12 = scmp.ge.s32.totalorder %s5688_s15, 1 }
  0x28   : > { %5158 = dma.hbm_to_vmem [thread:$0]  (!%p5763_p8), %s5770_s28, 14208, %s5772_s30, %s140_s4, %s5691_s23, %s5692_s24, %s5693_s26  }
  0x29   : > { %p177_p2 = scmp.lt.s32.totalorder %s5688_s15, 3  ;;  %s5148_s27 = smul.u32 111, %s5759_s22 }
  0x2a   : > { %s5138_s5 = smul.u32 1776, %s5688_s15  ;;  %s161_s28 = scalar_lea.sflag [#allocation5], %s5759_s22 }
  0x2b   : > { %p5805_p3 = pnand %p4966_p12, %p177_p2  ;;  %s164_s9 = scalar_lea.vmem [#allocation4], %s5148_s27 }
  0x2c   : > { %s5813_s8 = scalar_lea.hbm %s6531_s2, %s5138_s5  ;;  %s172_s10 = sshll.u32 %s164_s9, 4  ;;  %s173_s10 = int_to_ptr.vmem [resolvable:$true] %s172_s10 }
  0x2d   : > { %s6536_s29 = scalar_select %p5805_p3, 1, 0 }
  0x2e   : > { %s5620_s30 = scalar_lea.hbm %s5813_s8, 1776  ;;  %s5625_s12 = scalar_lea.hbm %s6531_s2, 3552 }
  0x2f   : > { %p5621_p4 = scmp.ne.s32.totalorder %s5813_s8, %s5620_s30  ;;  %p5626_p9 = scmp.lt.u32.totalorder %s5813_s8, %s6531_s2 }
  0x30   : > { %p5627_p11 = scmp.lt.u32.totalorder %s5625_s12, %s5620_s30  ;;  %p5629_p0 = scmp.lt.u32.totalorder %s5620_s30, %s5813_s8 }
  0x31   : > { %p5623_p5 = pnand %p5621_p4, %p5592_p10 }
  0x32   : > { %p5628_p13 = por %p5627_p11, %p5626_p9 }
  0x33   : > { %p5624_p6 = pneg %p5623_p5 }
  0x34   : > { %p5630_p1 = por %p5629_p0, %p5628_p13 }
  0x36   : > { %p5631_p12 = pnand %p5630_p1, %p5624_p6 }
  0x38   : > { %5634 = shalt.err (!%p5631_p12)
}
  0x39   : > { %s5635_s22 = scalar_lea.vmem %s173_s10, 1776  ;;  %s5694_s23 = smov [#allocation4]  }
  0x3a   : > { %p5636_p2 = scmp.ne.s32.totalorder %s173_s10, %s5635_s22  ;;  %s5640_s24 = sshll.u32 %s5694_s23, 4  ;;  %s5641_s24 = int_to_ptr.vmem [resolvable:$false] %s5640_s24 }
  0x3b   : > { %s5642_s26 = scalar_lea.vmem %s5641_s24, 3552  ;;  %p5643_p7 = scmp.lt.s32.totalorder %s173_s10, %s5641_s24 }
  0x3c   : > { %p5638_p4 = pnand %p5636_p2, %p5592_p10  ;;  %p5644_p3 = scmp.lt.s32.totalorder %s5642_s26, %s5635_s22 }
  0x3e   : > { %p5639_p5 = pneg %p5638_p4  ;;  %p5645_p9 = por %p5644_p3, %p5643_p7 }
  0x40   : > { %p5646_p11 = pnand %p5645_p9, %p5639_p5 }
  0x42   : > { %5649 = shalt.err (!%p5646_p11)
}
  0x43   : > { %5161 = dma.hbm_to_vmem [thread:$0]  (!%p5763_p8), %s5813_s8, 1776, %s173_s10, %s161_s28  }
  0x44   : > { %p6537_p6 = scmp.ne.s32.totalorder %s6536_s29, 0 }
  0x45   : > { %s183_s27 = sand.u32 (!%p6537_p6), 1, %s5680_s13   ;;  %p6538_p10 = scmp.ne.s32.totalorder (!%p6537_p6), %s6534_s21, 0 }
  0x46   : > { %181 = sbr.rel (%p6537_p6) target bundleno = 544 (0x220), region = 32  ;;  %s184_s6 = scalar_lea.sflag (!%p6537_p6), [#allocation3], %s183_s27 }
  0x47   : > { %s5149_s5 = smul.u32 (!%p6537_p6), 888, %s183_s27 }
  0x49   : > { %s5838_s7 = scalar_lea.vmem (!%p6537_p6), [#allocation2], %s5149_s5 }
  0x4d   : > { %5667 = dma.done.wait (%p6538_p10), %s184_s6, 14208  }
  0x4e   : > { %5669 = vsyncadd (%p6538_p10), %s184_s6, 4294953088  ;;  %s5150_s9 = smul.u32 111, %s183_s27  ;;  %s193_s25 = scalar_lea.sflag [#allocation5], %s183_s27 }
  0x50   : > { %s5844_s30 = scalar_lea.vmem [#allocation4], %s5150_s9 }
  0x51   : > { %5671 = dma.done.wait (%p6538_p10), %s193_s25, 1776  }
  0x52   : > { %5673 = vsyncadd (%p6538_p10), %s193_s25, 4294965520  ;;  %v5695_v0 = vmov 0   ;;  %v5202_v1 = vld [vmem:[%s5838_s7 + $0x4] ss:$444 sps:$4 sm:$0xff]   ;;  %v5204_v2 = vld [vmem:[%s5838_s7 + $0xc] ss:$444 sps:$4 sm:$0xff]  }
  0x53   : > { %1521 = vmatprep.mubr.bf16.mxu0 %v5695_v0  ;;  %1562 = vmatprep.mubr.bf16.mxu1 %v5695_v0  ;;  %v5206_v3 = vld [vmem:[%s5838_s7] ss:$444 sps:$4 sm:$0xff]   ;;  %v5207_v4 = vld [vmem:[%s5838_s7 + $0x8] ss:$444 sps:$4 sm:$0xff]   ;;  %v5208_v6 = vld [vmem:[%s5838_s7 + $0x10] ss:$444 sps:$4 sm:$0xff]  }
  0x54   : > { %1489 = vmatprep.subr.bf16.mxu0 %v5202_v1  ;;  %v5859_v5 = vld [vmem:[%s6529_s0] sm:$0x1]  ;;  %1530 = vmatprep.subr.bf16.mxu1 %v5204_v2  ;;  %vm1485_vm0 = vcmask 130048   ;;  %v5210_v7 = vld [vmem:[%s5838_s7 + $0x14] ss:$444 sps:$4 sm:$0xff]   ;;  %vm5697_vm1 = vmmov 0  }
  0x55   : > { %1490 = vmatpush1.bf16.msra.mxu0 %v5206_v3  ;;  %1531 = vmatpush1.bf16.msra.mxu1 %v5207_v4  ;;  %v5211_v8 = vld [vmem:[%s5838_s7 + $0x18] ss:$444 sps:$4 sm:$0xff]   ;;  %v5216_v10 = vld [vmem:[%s5838_s7 + $0x24] ss:$444 sps:$4 sm:$0xff]   ;;  %v5219_v11 = vld [vmem:[%s5838_s7 + $0x2c] ss:$444 sps:$4 sm:$0xff]  }
  0x56   : > { %v5213_v9 = vld [vmem:[%s5838_s7 + $0x1c] ss:$444 sps:$4 sm:$0xff]   ;;  %1571 = vmatprep.subr.bf16.mxu0 %v5210_v7  ;;  %v5217_v13 = vld [vmem:[%s5838_s7 + $0x28] ss:$444 sps:$4 sm:$0xff]   ;;  %v5222_v14 = vld [vmem:[%s5838_s7 + $0x34] ss:$444 sps:$4 sm:$0xff]  }
  0x57   : > { %1612 = vmatprep.subr.bf16.mxu1 %v5213_v9  ;;  %v5214_v12 = vld [vmem:[%s5838_s7 + $0x20] ss:$444 sps:$4 sm:$0xff]   ;;  %v5220_v16 = vld [vmem:[%s5838_s7 + $0x30] ss:$444 sps:$4 sm:$0xff]   ;;  %v5223_v17 = vld [vmem:[%s5838_s7 + $0x38] ss:$444 sps:$4 sm:$0xff]  }
  0x58   : > { %5079 = vmatmul.mubr.msk.bf16.vlgmr.msra.gmra.mrb[0].mxu0 %vm1485_vm0, %v5859_v5  ;;  %5080 = vmatmul.mubr.msk.bf16.vlgmr.msra.gmra.mrb[0].mxu1 %vm1485_vm0, %v5859_v5  ;;  %v5225_v15 = vld [vmem:[%s5838_s7 + $0x3c] ss:$444 sps:$4 sm:$0xff]   ;;  %v5228_v18 = vld [vmem:[%s5838_s7 + $0x44] ss:$444 sps:$4 sm:$0xff]   ;;  %v5231_v19 = vld [vmem:[%s5838_s7 + $0x4c] ss:$444 sps:$4 sm:$0xff]  }
  0x59   : > { %1572 = vmatpush1.bf16.msra.mxu0 %v5208_v6  ;;  %1613 = vmatpush1.bf16.msra.mxu1 %v5211_v8  ;;  %v5226_v20 = vld [vmem:[%s5838_s7 + $0x40] ss:$444 sps:$4 sm:$0xff]   ;;  %v5229_v21 = vld [vmem:[%s5838_s7 + $0x48] ss:$444 sps:$4 sm:$0xff]   ;;  %v5234_v22 = vld [vmem:[%s5838_s7 + $0x54] ss:$444 sps:$4 sm:$0xff]  }
  0x5a   : > { %1603 = vmatprep.mubr.bf16.mxu0 %v5695_v0  ;;  %1644 = vmatprep.mubr.bf16.mxu1 %v5695_v0  ;;  %v5237_v23 = vld [vmem:[%s5838_s7 + $0x5c] ss:$444 sps:$4 sm:$0xff]   ;;  %v5232_v24 = vld [vmem:[%s5838_s7 + $0x50] ss:$444 sps:$4 sm:$0xff]   ;;  %v5240_v26 = vld [vmem:[%s5838_s7 + $0x64] ss:$444 sps:$4 sm:$0xff]  }
  0x5b   : > { %1653 = vmatprep.subr.bf16.mxu0 %v5216_v10  ;;  %1694 = vmatprep.subr.bf16.mxu1 %v5219_v11  ;;  %v5235_v25 = vld [vmem:[%s5838_s7 + $0x58] ss:$444 sps:$4 sm:$0xff]   ;;  %v5243_v27 = vld [vmem:[%s5838_s7 + $0x6c] ss:$444 sps:$4 sm:$0xff]   ;;  %v5238_v28 = vld [vmem:[%s5838_s7 + $0x60] ss:$444 sps:$4 sm:$0xff]  }
  0x5c   : > { %v5241_v29 = vld [vmem:[%s5838_s7 + $0x68] ss:$444 sps:$4 sm:$0xff]   ;;  %v5246_v30 = vld [vmem:[%s5838_s7 + $0x74] ss:$444 sps:$4 sm:$0xff]   ;;  %v5249_v31 = vld [vmem:[%s5838_s7 + $0x7c] ss:$444 sps:$4 sm:$0xff]  }
  0x5d   : > { %v5244_v32 = vld [vmem:[%s5838_s7 + $0x70] ss:$444 sps:$4 sm:$0xff]   ;;  %v5247_v33 = vld [vmem:[%s5838_s7 + $0x78] ss:$444 sps:$4 sm:$0xff]   ;;  %v5252_v34 = vld [vmem:[%s5838_s7 + $0x84] ss:$444 sps:$4 sm:$0xff]  }
  0x5e   : > { %v5255_v35 = vld [vmem:[%s5838_s7 + $0x8c] ss:$444 sps:$4 sm:$0xff]   ;;  %v5250_v36 = vld [vmem:[%s5838_s7 + $0x80] ss:$444 sps:$4 sm:$0xff]   ;;  %v5258_v38 = vld [vmem:[%s5838_s7 + $0x94] ss:$444 sps:$4 sm:$0xff]  }
  0x5f   : > { %v5253_v37 = vld [vmem:[%s5838_s7 + $0x88] ss:$444 sps:$4 sm:$0xff]   ;;  %v5261_v39 = vld [vmem:[%s5838_s7 + $0x9c] ss:$444 sps:$4 sm:$0xff]   ;;  %v5256_v40 = vld [vmem:[%s5838_s7 + $0x90] ss:$444 sps:$4 sm:$0xff]  }
  0x60   : > { %5081 = vmatmul.mubr.msk.bf16.vlgmr.msra.gmra.mrb[4].mxu0 %vm1485_vm0, %v5859_v5  ;;  %5082 = vmatmul.mubr.msk.bf16.vlgmr.msra.gmra.mrb[4].mxu1 %vm1485_vm0, %v5859_v5  ;;  %v5259_v41 = vld [vmem:[%s5838_s7 + $0x98] ss:$444 sps:$4 sm:$0xff]   ;;  %v5264_v42 = vld [vmem:[%s5838_s7 + $0xa4] ss:$444 sps:$4 sm:$0xff]   ;;  %v5267_v43 = vld [vmem:[%s5838_s7 + $0xac] ss:$444 sps:$4 sm:$0xff]  }
  0x61   : > { %1654 = vmatpush1.bf16.msra.mxu0 %v5214_v12  ;;  %1695 = vmatpush1.bf16.msra.mxu1 %v5217_v13  ;;  %v5262_v44 = vld [vmem:[%s5838_s7 + $0xa0] ss:$444 sps:$4 sm:$0xff]   ;;  %v5265_v45 = vld [vmem:[%s5838_s7 + $0xa8] ss:$444 sps:$4 sm:$0xff]   ;;  %v5270_v46 = vld [vmem:[%s5838_s7 + $0xb4] ss:$444 sps:$4 sm:$0xff]  }
  0x62   : > { %1685 = vmatprep.mubr.bf16.mxu0 %v5695_v0  ;;  %1726 = vmatprep.mubr.bf16.mxu1 %v5695_v0  ;;  %v5273_v47 = vld [vmem:[%s5838_s7 + $0xbc] ss:$444 sps:$4 sm:$0xff]   ;;  %v5268_v48 = vld [vmem:[%s5838_s7 + $0xb0] ss:$444 sps:$4 sm:$0xff]   ;;  %v5276_v50 = vld [vmem:[%s5838_s7 + $0xc4] ss:$444 sps:$4 sm:$0xff]  }
  0x63   : > { %1735 = vmatprep.subr.bf16.mxu0 %v5222_v14  ;;  %1776 = vmatprep.subr.bf16.mxu1 %v5225_v15  ;;  %v5271_v49 = vld [vmem:[%s5838_s7 + $0xb8] ss:$444 sps:$4 sm:$0xff]   ;;  %v5279_v51 = vld [vmem:[%s5838_s7 + $0xcc] ss:$444 sps:$4 sm:$0xff]   ;;  %v5274_v52 = vld [vmem:[%s5838_s7 + $0xc0] ss:$444 sps:$4 sm:$0xff]  }
  0x64   : > { %v5277_v53 = vld [vmem:[%s5838_s7 + $0xc8] ss:$444 sps:$4 sm:$0xff]   ;;  %v5282_v54 = vld [vmem:[%s5838_s7 + $0xd4] ss:$444 sps:$4 sm:$0xff]   ;;  %v5285_v55 = vld [vmem:[%s5838_s7 + $0xdc] ss:$444 sps:$4 sm:$0xff]  }
  0x65   : > { %v5280_v56 = vld [vmem:[%s5838_s7 + $0xd0] ss:$444 sps:$4 sm:$0xff]   ;;  %v5283_v57 = vld [vmem:[%s5838_s7 + $0xd8] ss:$444 sps:$4 sm:$0xff]   ;;  %v5288_v58 = vld [vmem:[%s5838_s7 + $0xe4] ss:$444 sps:$4 sm:$0xff]  }
  0x66   : > { %v5291_v59 = vld [vmem:[%s5838_s7 + $0xec] ss:$444 sps:$4 sm:$0xff]   ;;  %v5286_v60 = vld [vmem:[%s5838_s7 + $0xe0] ss:$444 sps:$4 sm:$0xff]   ;;  %v5294_v62 = vld [vmem:[%s5838_s7 + $0xf4] ss:$444 sps:$4 sm:$0xff]  }
  0x67   : > { %v5289_v61 = vld [vmem:[%s5838_s7 + $0xe8] ss:$444 sps:$4 sm:$0xff]   ;;  %v5297_v63 = vld [vmem:[%s5838_s7 + $0xfc] ss:$444 sps:$4 sm:$0xff]   ;;  %v5292_v1 = vld [vmem:[%s5838_s7 + $0xf0] ss:$444 sps:$4 sm:$0xff]  }
  0x68   : > { %5083 = vmatmul.mubr.msk.bf16.vlgmr.msra.gmra.mrb[8].mxu0 %vm1485_vm0, %v5859_v5  ;;  %5084 = vmatmul.mubr.msk.bf16.vlgmr.msra.gmra.mrb[8].mxu1 %vm1485_vm0, %v5859_v5  ;;  %v5295_v2 = vld [vmem:[%s5838_s7 + $0xf8] ss:$444 sps:$4 sm:$0xff]   ;;  %v5300_v3 = vld [vmem:[%s5838_s7 + $0x104] ss:$444 sps:$4 sm:$0xff]   ;;  %v5303_v4 = vld [vmem:[%s5838_s7 + $0x10c] ss:$444 sps:$4 sm:$0xff]  }
  0x69   : > { %1736 = vmatpush1.bf16.msra.mxu0 %v5220_v16  ;;  %1777 = vmatpush1.bf16.msra.mxu1 %v5223_v17  ;;  %v5298_v6 = vld [vmem:[%s5838_s7 + $0x100] ss:$444 sps:$4 sm:$0xff]   ;;  %v5301_v7 = vld [vmem:[%s5838_s7 + $0x108] ss:$444 sps:$4 sm:$0xff]   ;;  %v5306_v8 = vld [vmem:[%s5838_s7 + $0x114] ss:$444 sps:$4 sm:$0xff]  }
  0x6a   : > { %1767 = vmatprep.mubr.bf16.mxu0 %v5695_v0  ;;  %1808 = vmatprep.mubr.bf16.mxu1 %v5695_v0  ;;  %v5309_v9 = vld [vmem:[%s5838_s7 + $0x11c] ss:$444 sps:$4 sm:$0xff]   ;;  %v5304_v10 = vld [vmem:[%s5838_s7 + $0x110] ss:$444 sps:$4 sm:$0xff]   ;;  %v5312_v12 = vld [vmem:[%s5838_s7 + $0x124] ss:$444 sps:$4 sm:$0xff]  }
  0x6b   : > { %1817 = vmatprep.subr.bf16.mxu0 %v5228_v18  ;;  %1858 = vmatprep.subr.bf16.mxu1 %v5231_v19  ;;  %v5307_v11 = vld [vmem:[%s5838_s7 + $0x118] ss:$444 sps:$4 sm:$0xff]   ;;  %v5315_v13 = vld [vmem:[%s5838_s7 + $0x12c] ss:$444 sps:$4 sm:$0xff]   ;;  %v5310_v14 = vld [vmem:[%s5838_s7 + $0x120] ss:$444 sps:$4 sm:$0xff]  }
  0x6c   : > { %v5313_v15 = vld [vmem:[%s5838_s7 + $0x128] ss:$444 sps:$4 sm:$0xff]   ;;  %v5318_v16 = vld [vmem:[%s5838_s7 + $0x134] ss:$444 sps:$4 sm:$0xff]   ;;  %v5321_v17 = vld [vmem:[%s5838_s7 + $0x13c] ss:$444 sps:$4 sm:$0xff]  }
  0x6d   : > { %v5316_v18 = vld [vmem:[%s5838_s7 + $0x130] ss:$444 sps:$4 sm:$0xff]   ;;  %v5319_v19 = vld [vmem:[%s5838_s7 + $0x138] ss:$444 sps:$4 sm:$0xff]   ;;  %s6170_s8 = smul.u32 111, %s4960_s16 }
  0x6f   : > { %p227_p7 = scmp.lt.s32.totalorder %s6170_s8, 221 }
  0x70   : > { %5085 = vmatmul.mubr.msk.bf16.vlgmr.msra.gmra.mrb[12].mxu0 %vm1485_vm0, %v5859_v5  ;;  %5086 = vmatmul.mubr.msk.bf16.vlgmr.msra.gmra.mrb[12].mxu1 %vm1485_vm0, %v5859_v5 }
  0x71   : > { %1818 = vmatpush1.bf16.msra.mxu0 %v5226_v20  ;;  %1859 = vmatpush1.bf16.msra.mxu1 %v5229_v21  ;;  %v5324_v20 = vld [vmem:[%s5838_s7 + $0x144] ss:$444 sps:$4 sm:$0xff]   ;;  %v5327_v21 = vld [vmem:[%s5838_s7 + $0x14c] ss:$444 sps:$4 sm:$0xff]   ;;  %s6544_s8 = smov (!%p227_p7, %s6170_s8), 221 }
  0x72   : > { %1849 = vmatprep.mubr.bf16.mxu0 %v5695_v0  ;;  %1890 = vmatprep.mubr.bf16.mxu1 %v5695_v0  ;;  %s4967_s15 = sshll.u32 %s6544_s8, 1 }
  0x73   : > { %1899 = vmatprep.subr.bf16.mxu0 %v5234_v22  ;;  %1940 = vmatprep.subr.bf16.mxu1 %v5237_v23  ;;  %v5322_v22 = vld [vmem:[%s5838_s7 + $0x140] ss:$444 sps:$4 sm:$0xff]   ;;  %v5325_v23 = vld [vmem:[%s5838_s7 + $0x148] ss:$444 sps:$4 sm:$0xff]   ;;  %s6206_s28 = scalar_lea.vmem %s6532_s3, %s4967_s15 }
  0x78   : > { %5087 = vmatmul.mubr.msk.bf16.vlgmr.msra.gmra.mrb[16].mxu0 %vm1485_vm0, %v5859_v5  ;;  %5088 = vmatmul.mubr.msk.bf16.vlgmr.msra.gmra.mrb[16].mxu1 %vm1485_vm0, %v5859_v5 }
  0x79   : > { %1900 = vmatpush1.bf16.msra.mxu0 %v5232_v24  ;;  %1941 = vmatpush1.bf16.msra.mxu1 %v5235_v25  ;;  %v5330_v24 = vld [vmem:[%s5838_s7 + $0x154] ss:$444 sps:$4 sm:$0xff]   ;;  %v5333_v25 = vld [vmem:[%s5838_s7 + $0x15c] ss:$444 sps:$4 sm:$0xff]  }
  0x7a   : > { %1931 = vmatprep.mubr.bf16.mxu0 %v5695_v0  ;;  %1972 = vmatprep.mubr.bf16.mxu1 %v5695_v0 }
  0x7b   : > { %1981 = vmatprep.subr.bf16.mxu0 %v5240_v26  ;;  %2022 = vmatprep.subr.bf16.mxu1 %v5243_v27  ;;  %v5328_v26 = vld [vmem:[%s5838_s7 + $0x150] ss:$444 sps:$4 sm:$0xff]   ;;  %v5331_v27 = vld [vmem:[%s5838_s7 + $0x158] ss:$444 sps:$4 sm:$0xff]  }
  0x80   : > { %5089 = vmatmul.mubr.msk.bf16.vlgmr.msra.gmra.mrb[20].mxu0 %vm1485_vm0, %v5859_v5  ;;  %5090 = vmatmul.mubr.msk.bf16.vlgmr.msra.gmra.mrb[20].mxu1 %vm1485_vm0, %v5859_v5 }
  0x81   : > { %1982 = vmatpush1.bf16.msra.mxu0 %v5238_v28  ;;  %2023 = vmatpush1.bf16.msra.mxu1 %v5241_v29  ;;  %v5336_v28 = vld [vmem:[%s5838_s7 + $0x164] ss:$444 sps:$4 sm:$0xff]   ;;  %v5339_v29 = vld [vmem:[%s5838_s7 + $0x16c] ss:$444 sps:$4 sm:$0xff]  }
  0x82   : > { %2013 = vmatprep.mubr.bf16.mxu0 %v5695_v0  ;;  %2054 = vmatprep.mubr.bf16.mxu1 %v5695_v0 }
  0x83   : > { %2063 = vmatprep.subr.bf16.mxu0 %v5246_v30  ;;  %2104 = vmatprep.subr.bf16.mxu1 %v5249_v31  ;;  %v5334_v30 = vld [vmem:[%s5838_s7 + $0x160] ss:$444 sps:$4 sm:$0xff]   ;;  %v5337_v31 = vld [vmem:[%s5838_s7 + $0x168] ss:$444 sps:$4 sm:$0xff]  }
  0x88   : > { %5091 = vmatmul.mubr.msk.bf16.vlgmr.msra.gmra.mrb[24].mxu0 %vm1485_vm0, %v5859_v5  ;;  %5092 = vmatmul.mubr.msk.bf16.vlgmr.msra.gmra.mrb[24].mxu1 %vm1485_vm0, %v5859_v5 }
  0x89   : > { %2064 = vmatpush1.bf16.msra.mxu0 %v5244_v32  ;;  %2105 = vmatpush1.bf16.msra.mxu1 %v5247_v33  ;;  %v5342_v32 = vld [vmem:[%s5838_s7 + $0x174] ss:$444 sps:$4 sm:$0xff]   ;;  %v5345_v33 = vld [vmem:[%s5838_s7 + $0x17c] ss:$444 sps:$4 sm:$0xff]  }
  0x8a   : > { %2095 = vmatprep.mubr.bf16.mxu0 %v5695_v0  ;;  %2136 = vmatprep.mubr.bf16.mxu1 %v5695_v0 }
  0x8b   : > { %2145 = vmatprep.subr.bf16.mxu0 %v5252_v34  ;;  %2186 = vmatprep.subr.bf16.mxu1 %v5255_v35  ;;  %v5340_v34 = vld [vmem:[%s5838_s7 + $0x170] ss:$444 sps:$4 sm:$0xff]   ;;  %v5343_v35 = vld [vmem:[%s5838_s7 + $0x178] ss:$444 sps:$4 sm:$0xff]  }
  0x90   : > { %5093 = vmatmul.mubr.msk.bf16.vlgmr.msra.gmra.mrb[28].mxu0 %vm1485_vm0, %v5859_v5  ;;  %5094 = vmatmul.mubr.msk.bf16.vlgmr.msra.gmra.mrb[28].mxu1 %vm1485_vm0, %v5859_v5 }
  0x91   : > { %2146 = vmatpush1.bf16.msra.mxu0 %v5250_v36  ;;  %2187 = vmatpush1.bf16.msra.mxu1 %v5253_v37  ;;  %v5348_v36 = vld [vmem:[%s5838_s7 + $0x184] ss:$444 sps:$4 sm:$0xff]   ;;  %v5351_v37 = vld [vmem:[%s5838_s7 + $0x18c] ss:$444 sps:$4 sm:$0xff]  }
  0x92   : > { %2177 = vmatprep.mubr.bf16.mxu0 %v5695_v0  ;;  %2218 = vmatprep.mubr.bf16.mxu1 %v5695_v0 }
  0x93   : > { %2227 = vmatprep.subr.bf16.mxu0 %v5258_v38  ;;  %2268 = vmatprep.subr.bf16.mxu1 %v5261_v39  ;;  %v5346_v38 = vld [vmem:[%s5838_s7 + $0x180] ss:$444 sps:$4 sm:$0xff]   ;;  %v5349_v39 = vld [vmem:[%s5838_s7 + $0x188] ss:$444 sps:$4 sm:$0xff]  }
  0x98   : > { %5095 = vmatmul.mubr.msk.bf16.vlgmr.msra.gmra.mrb[32].mxu0 %vm1485_vm0, %v5859_v5  ;;  %5096 = vmatmul.mubr.msk.bf16.vlgmr.msra.gmra.mrb[32].mxu1 %vm1485_vm0, %v5859_v5 }
  0x99   : > { %2228 = vmatpush1.bf16.msra.mxu0 %v5256_v40  ;;  %2269 = vmatpush1.bf16.msra.mxu1 %v5259_v41  ;;  %v5354_v40 = vld [vmem:[%s5838_s7 + $0x194] ss:$444 sps:$4 sm:$0xff]   ;;  %v5357_v41 = vld [vmem:[%s5838_s7 + $0x19c] ss:$444 sps:$4 sm:$0xff]  }
  0x9a   : > { %2259 = vmatprep.mubr.bf16.mxu0 %v5695_v0  ;;  %2300 = vmatprep.mubr.bf16.mxu1 %v5695_v0 }
  0x9b   : > { %2309 = vmatprep.subr.bf16.mxu0 %v5264_v42  ;;  %2350 = vmatprep.subr.bf16.mxu1 %v5267_v43  ;;  %v5352_v42 = vld [vmem:[%s5838_s7 + $0x190] ss:$444 sps:$4 sm:$0xff]   ;;  %v5355_v43 = vld [vmem:[%s5838_s7 + $0x198] ss:$444 sps:$4 sm:$0xff]  }
  0xa0   : > { %5097 = vmatmul.mubr.msk.bf16.vlgmr.msra.gmra.mrb[36].mxu0 %vm1485_vm0, %v5859_v5  ;;  %5098 = vmatmul.mubr.msk.bf16.vlgmr.msra.gmra.mrb[36].mxu1 %vm1485_vm0, %v5859_v5 }
  0xa1   : > { %2310 = vmatpush1.bf16.msra.mxu0 %v5262_v44  ;;  %2351 = vmatpush1.bf16.msra.mxu1 %v5265_v45  ;;  %v5360_v44 = vld [vmem:[%s5838_s7 + $0x1a4] ss:$444 sps:$4 sm:$0xff]   ;;  %v5363_v45 = vld [vmem:[%s5838_s7 + $0x1ac] ss:$444 sps:$4 sm:$0xff]  }
  0xa2   : > { %2341 = vmatprep.mubr.bf16.mxu0 %v5695_v0  ;;  %2382 = vmatprep.mubr.bf16.mxu1 %v5695_v0 }
  0xa3   : > { %2391 = vmatprep.subr.bf16.mxu0 %v5270_v46  ;;  %2432 = vmatprep.subr.bf16.mxu1 %v5273_v47  ;;  %v374_v46 = vlaneseq  ;;  %v5358_v47 = vld [vmem:[%s5838_s7 + $0x1a0] ss:$444 sps:$4 sm:$0xff]  }
  0xa8   : > { %5099 = vmatmul.mubr.msk.bf16.vlgmr.msra.gmra.mrb[40].mxu0 %vm1485_vm0, %v5859_v5  ;;  %5100 = vmatmul.mubr.msk.bf16.vlgmr.msra.gmra.mrb[40].mxu1 %vm1485_vm0, %v5859_v5 }
  0xa9   : > { %2392 = vmatpush1.bf16.msra.mxu0 %v5268_v48  ;;  %2433 = vmatpush1.bf16.msra.mxu1 %v5271_v49  ;;  %v5361_v48 = vld [vmem:[%s5838_s7 + $0x1a8] ss:$444 sps:$4 sm:$0xff]   ;;  %v5366_v49 = vld [vmem:[%s5838_s7 + $0x1b4] ss:$444 sps:$4 sm:$0xff]  }
  0xaa   : > { %2423 = vmatprep.mubr.bf16.mxu0 %v5695_v0  ;;  %2464 = vmatprep.mubr.bf16.mxu1 %v5695_v0 }
  0xab   : > { %2473 = vmatprep.subr.bf16.mxu0 %v5276_v50  ;;  %2514 = vmatprep.subr.bf16.mxu1 %v5279_v51  ;;  %v6120_v50 = vshrl.u32 %v374_v46, 7  ;;  %v5696_v51 = vmov 0.0  }
  0xb0   : > { %5101 = vmatmul.mubr.msk.bf16.vlgmr.msra.gmra.mrb[44].mxu0 %vm1485_vm0, %v5859_v5  ;;  %5102 = vmatmul.mubr.msk.bf16.vlgmr.msra.gmra.mrb[44].mxu1 %vm1485_vm0, %v5859_v5 }
  0xb1   : > { %2474 = vmatpush1.bf16.msra.mxu0 %v5274_v52  ;;  %2515 = vmatpush1.bf16.msra.mxu1 %v5277_v53  ;;  %v5364_v52 = vld [vmem:[%s5838_s7 + $0x1b0] ss:$444 sps:$4 sm:$0xff]   ;;  %v6126_v53 = vsub.s32 0, %v6120_v50 }
  0xb2   : > { %2505 = vmatprep.mubr.bf16.mxu0 %v5695_v0  ;;  %2546 = vmatprep.mubr.bf16.mxu1 %v5695_v0 }
  0xb3   : > { %2555 = vmatprep.subr.bf16.mxu0 %v5282_v54  ;;  %2596 = vmatprep.subr.bf16.mxu1 %v5285_v55  ;;  %v6129_v54 = vsub.s32 2, %v6120_v50  ;;  %v346_v55 = vld [vmem:[%s5844_s30] sm:$0xff] }
  0xb8   : > { %5103 = vmatmul.mubr.msk.bf16.vlgmr.msra.gmra.mrb[48].mxu0 %vm1485_vm0, %v5859_v5  ;;  %5104 = vmatmul.mubr.msk.bf16.vlgmr.msra.gmra.mrb[48].mxu1 %vm1485_vm0, %v5859_v5 }
  0xb9   : > { %2556 = vmatpush1.bf16.msra.mxu0 %v5280_v56  ;;  %2597 = vmatpush1.bf16.msra.mxu1 %v5283_v57  ;;  %v6133_v56 = vsub.s32 1, %v6120_v50  ;;  %v6136_v57 = vsub.s32 3, %v6120_v50 }
  0xba   : > { %2587 = vmatprep.mubr.bf16.mxu0 %v5695_v0  ;;  %2628 = vmatprep.mubr.bf16.mxu1 %v5695_v0 }
  0xbb   : > { %2637 = vmatprep.subr.bf16.mxu0 %v5288_v58  ;;  %2678 = vmatprep.subr.bf16.mxu1 %v5291_v59  ;;  %v5367_v58 = vld [vmem:[%s5838_s7 + $0x1b8] ss:$444 sps:$4 sm:$0xff]   ;;  %v377_v59 = vrot.slane %v346_v55, %v6126_v53 }
  0xc0   : > { %5105 = vmatmul.mubr.msk.bf16.vlgmr.msra.gmra.mrb[52].mxu0 %vm1485_vm0, %v5859_v5  ;;  %5106 = vmatmul.mubr.msk.bf16.vlgmr.msra.gmra.mrb[52].mxu1 %vm1485_vm0, %v5859_v5 }
  0xc1   : > { %2638 = vmatpush1.bf16.msra.mxu0 %v5286_v60  ;;  %2679 = vmatpush1.bf16.msra.mxu1 %v5289_v61  ;;  %v385_v60 = vrot.slane %v346_v55, %v6129_v54  ;;  %v381_v61 = vrot.slane %v346_v55, %v6133_v56 }
  0xc2   : > { %2669 = vmatprep.mubr.bf16.mxu0 %v5695_v0  ;;  %2710 = vmatprep.mubr.bf16.mxu1 %v5695_v0 }
  0xc3   : > { %2719 = vmatprep.subr.bf16.mxu0 %v5294_v62  ;;  %2760 = vmatprep.subr.bf16.mxu1 %v5297_v63  ;;  %v389_v62 = vrot.slane %v346_v55, %v6136_v57 }
  0xc8   : > { %5107 = vmatmul.mubr.msk.bf16.vlgmr.msra.gmra.mrb[56].mxu0 %vm1485_vm0, %v5859_v5  ;;  %5108 = vmatmul.mubr.msk.bf16.vlgmr.msra.gmra.mrb[56].mxu1 %vm1485_vm0, %v5859_v5 }
  0xc9   : > { %2720 = vmatpush1.bf16.msra.mxu0 %v5292_v1  ;;  %2761 = vmatpush1.bf16.msra.mxu1 %v5295_v2 }
  0xca   : > { %2751 = vmatprep.mubr.bf16.mxu0 %v5695_v0  ;;  %2792 = vmatprep.mubr.bf16.mxu1 %v5695_v0 }
  0xcb   : > { %2801 = vmatprep.subr.bf16.mxu0 %v5300_v3  ;;  %2842 = vmatprep.subr.bf16.mxu1 %v5303_v4 }
  0xd0   : > { %5109 = vmatmul.mubr.msk.bf16.vlgmr.msra.gmra.mrb[60].mxu0 %vm1485_vm0, %v5859_v5  ;;  %5110 = vmatmul.mubr.msk.bf16.vlgmr.msra.gmra.mrb[60].mxu1 %vm1485_vm0, %v5859_v5 }
  0xd1   : > { %2802 = vmatpush1.bf16.msra.mxu0 %v5298_v6  ;;  %2843 = vmatpush1.bf16.msra.mxu1 %v5301_v7  ;;  %v6149_v7 = vsub.s32 4, %v6120_v50 }
  0xd2   : > { %2833 = vmatprep.mubr.bf16.mxu0 %v5695_v0  ;;  %2874 = vmatprep.mubr.bf16.mxu1 %v5695_v0 }
  0xd3   : > { %2883 = vmatprep.subr.bf16.mxu0 %v5306_v8  ;;  %2924 = vmatprep.subr.bf16.mxu1 %v5309_v9  ;;  %v6152_v8 = vsub.s32 6, %v6120_v50 }
  0xd8   : > { %5111 = vmatmul.mubr.msk.bf16.vlgmr.msra.gmra.mrb[64].mxu0 %vm1485_vm0, %v5859_v5  ;;  %5112 = vmatmul.mubr.msk.bf16.vlgmr.msra.gmra.mrb[64].mxu1 %vm1485_vm0, %v5859_v5 }
  0xd9   : > { %2884 = vmatpush1.bf16.msra.mxu0 %v5304_v10  ;;  %2925 = vmatpush1.bf16.msra.mxu1 %v5307_v11 }
  0xda   : > { %2915 = vmatprep.mubr.bf16.mxu0 %v5695_v0  ;;  %2956 = vmatprep.mubr.bf16.mxu1 %v5695_v0 }
  0xdb   : > { %2965 = vmatprep.subr.bf16.mxu0 %v5312_v12  ;;  %3006 = vmatprep.subr.bf16.mxu1 %v5315_v13  ;;  %v6158_v13 = vsub.s32 7, %v6120_v50 }
  0xe0   : > { %5113 = vmatmul.mubr.msk.bf16.vlgmr.msra.gmra.mrb[68].mxu0 %vm1485_vm0, %v5859_v5  ;;  %5114 = vmatmul.mubr.msk.bf16.vlgmr.msra.gmra.mrb[68].mxu1 %vm1485_vm0, %v5859_v5 }
  0xe1   : > { %2966 = vmatpush1.bf16.msra.mxu0 %v5310_v14  ;;  %3007 = vmatpush1.bf16.msra.mxu1 %v5313_v15 }
  0xe2   : > { %2997 = vmatprep.mubr.bf16.mxu0 %v5695_v0  ;;  %3038 = vmatprep.mubr.bf16.mxu1 %v5695_v0 }
  0xe3   : > { %3047 = vmatprep.subr.bf16.mxu0 %v5318_v16  ;;  %3088 = vmatprep.subr.bf16.mxu1 %v5321_v17 }
  0xe8   : > { %5115 = vmatmul.mubr.msk.bf16.vlgmr.msra.gmra.mrb[72].mxu0 %vm1485_vm0, %v5859_v5  ;;  %5116 = vmatmul.mubr.msk.bf16.vlgmr.msra.gmra.mrb[72].mxu1 %vm1485_vm0, %v5859_v5 }
  0xe9   : > { %3048 = vmatpush1.bf16.msra.mxu0 %v5316_v18  ;;  %3089 = vmatpush1.bf16.msra.mxu1 %v5319_v19 }
  0xea   : > { %3079 = vmatprep.mubr.bf16.mxu0 %v5695_v0  ;;  %3120 = vmatprep.mubr.bf16.mxu1 %v5695_v0 }
  0xeb   : > { %3129 = vmatprep.subr.bf16.mxu0 %v5324_v20  ;;  %3170 = vmatprep.subr.bf16.mxu1 %v5327_v21  ;;  %v393_v20 = vrot.slane %v346_v55, %v6149_v7  ;;  %v401_v21 = vrot.slane %v346_v55, %v6152_v8 }
  0xf0   : > { %5117 = vmatmul.mubr.msk.bf16.vlgmr.msra.gmra.mrb[76].mxu0 %vm1485_vm0, %v5859_v5  ;;  %5118 = vmatmul.mubr.msk.bf16.vlgmr.msra.gmra.mrb[76].mxu1 %vm1485_vm0, %v5859_v5 }
  0xf1   : > { %3130 = vmatpush1.bf16.msra.mxu0 %v5322_v22  ;;  %3171 = vmatpush1.bf16.msra.mxu1 %v5325_v23  ;;  %v405_v23 = vrot.slane %v346_v55, %v6158_v13 }
  0xf2   : > { %3161 = vmatprep.mubr.bf16.mxu0 %v5695_v0  ;;  %3202 = vmatprep.mubr.bf16.mxu1 %v5695_v0 }
  0xf3   : > { %3211 = vmatprep.subr.bf16.mxu0 %v5330_v24  ;;  %3252 = vmatprep.subr.bf16.mxu1 %v5333_v25 }
  0xf8   : > { %5119 = vmatmul.mubr.msk.bf16.vlgmr.msra.gmra.mrb[80].mxu0 %vm1485_vm0, %v5859_v5  ;;  %5120 = vmatmul.mubr.msk.bf16.vlgmr.msra.gmra.mrb[80].mxu1 %vm1485_vm0, %v5859_v5 }
  0xf9   : > { %3212 = vmatpush1.bf16.msra.mxu0 %v5328_v26  ;;  %3253 = vmatpush1.bf16.msra.mxu1 %v5331_v27 }
  0xfa   : > { %3243 = vmatprep.mubr.bf16.mxu0 %v5695_v0  ;;  %3284 = vmatprep.mubr.bf16.mxu1 %v5695_v0 }
  0xfb   : > { %3293 = vmatprep.subr.bf16.mxu0 %v5336_v28  ;;  %3334 = vmatprep.subr.bf16.mxu1 %v5339_v29 }
 0x100   : > { %5121 = vmatmul.mubr.msk.bf16.vlgmr.msra.gmra.mrb[84].mxu0 %vm1485_vm0, %v5859_v5  ;;  %5122 = vmatmul.mubr.msk.bf16.vlgmr.msra.gmra.mrb[84].mxu1 %vm1485_vm0, %v5859_v5 }
 0x101   : > { %3294 = vmatpush1.bf16.msra.mxu0 %v5334_v30  ;;  %3335 = vmatpush1.bf16.msra.mxu1 %v5337_v31 }
 0x102   : > { %3325 = vmatprep.mubr.bf16.mxu0 %v5695_v0  ;;  %3366 = vmatprep.mubr.bf16.mxu1 %v5695_v0 }
 0x103   : > { %3375 = vmatprep.subr.bf16.mxu0 %v5342_v32  ;;  %3416 = vmatprep.subr.bf16.mxu1 %v5345_v33  ;;  %v6173_v33 = vld [vmem:[%s5844_s30 + $0x8] sm:$0xff] }
 0x108   : > { %5123 = vmatmul.mubr.msk.bf16.vlgmr.msra.gmra.mrb[88].mxu0 %vm1485_vm0, %v5859_v5  ;;  %5124 = vmatmul.mubr.msk.bf16.vlgmr.msra.gmra.mrb[88].mxu1 %vm1485_vm0, %v5859_v5 }
 0x109   : > { %3376 = vmatpush1.bf16.msra.mxu0 %v5340_v34  ;;  %3417 = vmatpush1.bf16.msra.mxu1 %v5343_v35 }
 0x10a   : > { %3407 = vmatprep.mubr.bf16.mxu0 %v5695_v0  ;;  %3448 = vmatprep.mubr.bf16.mxu1 %v5695_v0 }
 0x10b   : > { %3457 = vmatprep.subr.bf16.mxu0 %v5348_v36  ;;  %3498 = vmatprep.subr.bf16.mxu1 %v5351_v37 }
 0x110   : > { %5125 = vmatmul.mubr.msk.bf16.vlgmr.msra.gmra.mrb[92].mxu0 %vm1485_vm0, %v5859_v5  ;;  %5126 = vmatmul.mubr.msk.bf16.vlgmr.msra.gmra.mrb[92].mxu1 %vm1485_vm0, %v5859_v5 }
 0x111   : > { %3458 = vmatpush1.bf16.msra.mxu0 %v5346_v38  ;;  %3499 = vmatpush1.bf16.msra.mxu1 %v5349_v39  ;;  %v5698_v38 = vmov 1983009808  }
 0x112   : > { %3489 = vmatprep.mubr.bf16.mxu0 %v5695_v0  ;;  %3530 = vmatprep.mubr.bf16.mxu1 %v5695_v0  ;;  %v4342_v39 = vunpack.c.l.s4 %v5698_v38 }
 0x113   : > { %3539 = vmatprep.subr.bf16.mxu0 %v5354_v40  ;;  %3580 = vmatprep.subr.bf16.mxu1 %v5357_v41 }
 0x118   : > { %5127 = vmatmul.mubr.msk.bf16.vlgmr.msra.gmra.mrb[96].mxu0 %vm1485_vm0, %v5859_v5  ;;  %5128 = vmatmul.mubr.msk.bf16.vlgmr.msra.gmra.mrb[96].mxu1 %vm1485_vm0, %v5859_v5 }
 0x119   : > { %3540 = vmatpush1.bf16.msra.mxu0 %v5352_v42  ;;  %3581 = vmatpush1.bf16.msra.mxu1 %v5355_v43  ;;  %v409_v42 = vrot.slane %v6173_v33, %v6126_v53  ;;  %v417_v43 = vrot.slane %v6173_v33, %v6129_v54 }
 0x11a   : > { %3571 = vmatprep.mubr.bf16.mxu0 %v5695_v0  ;;  %3612 = vmatprep.mubr.bf16.mxu1 %v5695_v0 }
 0x11b   : > { %3621 = vmatprep.subr.bf16.mxu0 %v5360_v44  ;;  %3662 = vmatprep.subr.bf16.mxu1 %v5363_v45  ;;  %v413_v44 = vrot.slane %v6173_v33, %v6133_v56  ;;  %v421_v45 = vrot.slane %v6173_v33, %v6136_v57 }
 0x120   : > { %5129 = vmatmul.mubr.msk.bf16.vlgmr.msra.gmra.mrb[100].mxu0 %vm1485_vm0, %v5859_v5  ;;  %5130 = vmatmul.mubr.msk.bf16.vlgmr.msra.gmra.mrb[100].mxu1 %vm1485_vm0, %v5859_v5 }
 0x121   : > { %3622 = vmatpush1.bf16.msra.mxu0 %v5358_v47  ;;  %3663 = vmatpush1.bf16.msra.mxu1 %v5361_v48 }
 0x122   : > { %3653 = vmatprep.mubr.bf16.mxu0 %v5695_v0  ;;  %3694 = vmatprep.mubr.bf16.mxu1 %v5695_v0 }
 0x123   : > { %3703 = vmatprep.subr.bf16.mxu0 %v5366_v49  ;;  %5141 = vmatprep.subr.bf16.mxu1 %v5696_v51  ;;  %v4343_v49 = vunpack.c.0.s8 %v4342_v39 }
 0x128   : > { %5131 = vmatmul.mubr.msk.bf16.vlgmr.msra.gmra.mrb[104].mxu0 %vm1485_vm0, %v5859_v5  ;;  %5132 = vmatmul.mubr.msk.bf16.vlgmr.msra.gmra.mrb[104].mxu1 %vm1485_vm0, %v5859_v5 }
 0x129   : > { %3704 = vmatpush1.bf16.msra.mxu0 %v5364_v52  ;;  %5142 = vmatpush3.bf16.msra.mxu1 %v5367_v58 }
 0x12a   : > { %3735 = vmatprep.mubr.bf16.mxu0 %v5695_v0  ;;  %5143 = vmatprep.mubr.msk.bf16.mxu1 %vm5697_vm1, %v5696_v51  ;;  %v6155_v0 = vsub.s32 5, %v6120_v50 }
 0x12b   : > { %v1523_v63 = vpop.f32.mrb[0].mxu0  ;;  %v1564_v1 = vpop.f32.mrb[0].mxu1 }
 0x12c   : > { %v1524_v2 = vadd.f32 %v1523_v63, %v377_v59  ;;  %v1565_v3 = vadd.f32 %v1564_v1, %v385_v60  ;;  %v1525_v4 = vpop.f32.mrb[1].mxu0  ;;  %v1566_v6 = vpop.f32.mrb[1].mxu1  ;;  %v397_v22 = vrot.slane %v346_v55, %v6155_v0 }
 0x12d   : > { %v1526_v9 = vadd.f32 %v1525_v4, %v381_v61  ;;  %v1567_v10 = vadd.f32 %v1566_v6, %v389_v62  ;;  %v1527_v11 = vpop.f32.mrb[2].mxu0  ;;  %v1568_v12 = vpop.f32.mrb[2].mxu1 }
 0x12e   : > { %v3784_v14 = vmul.f32 0.5, %v1524_v2  ;;  %v3786_v15 = vmul.f32 0.5, %v1565_v3  ;;  %v1528_v16 = vpop.f32.mrb[3].mxu0  ;;  %v1569_v17 = vpop.f32.mrb[3].mxu1 }
 0x12f   : > { %v3785_v18 = vmul.f32 0.5, %v1526_v9  ;;  %v3787_v19 = vmul.f32 0.5, %v1567_v10 }
 0x130   : > { %5368 = vtanh.f32 %v3784_v14  ;;  %5133 = vmatmul.mubr.msk.bf16.vlgmr.msra.gmra.mrb[108].mxu0 %vm1485_vm0, %v5859_v5  ;;  %5144 = vmatmul.mubr.msk.bf16.vlgmr.msra.gmra.mrb[108].mxu1 %vm1485_vm0, %v5859_v5 }
 0x131   : > { %5370 = vtanh.f32 %v3786_v15 }
 0x132   : > { %5372 = vtanh.f32 %v3785_v18  ;;  %v6190_v18 = vsub.s32 %v4343_v49, %v6120_v50 }
 0x133   : > { %5374 = vtanh.f32 %v3787_v19  ;;  %v1605_v24 = vpop.f32.mrb[4].mxu0  ;;  %v1646_v25 = vpop.f32.mrb[4].mxu1 }
 0x134   : > { %v1606_v26 = vadd.f32 %v1605_v24, %v393_v20  ;;  %v1647_v27 = vadd.f32 %v1646_v25, %v401_v21  ;;  %v1607_v28 = vpop.f32.mrb[5].mxu0  ;;  %v1648_v29 = vpop.f32.mrb[5].mxu1  ;;  %v429_v25 = vrot.slane %v6173_v33, %v6155_v0 }
 0x135   : > { %v1608_v5 = vadd.f32 %v1607_v28, %v397_v22  ;;  %v1649_v30 = vadd.f32 %v1648_v29, %v405_v23  ;;  %v1609_v31 = vpop.f32.mrb[6].mxu0  ;;  %v1650_v32 = vpop.f32.mrb[6].mxu1  ;;  %v425_v22 = vrot.slane %v6173_v33, %v6149_v7  ;;  %v433_v23 = vrot.slane %v6173_v33, %v6152_v8 }
 0x136   : > { %v3788_v34 = vmul.f32 0.5, %v1606_v26  ;;  %v3790_v35 = vmul.f32 0.5, %v1647_v27  ;;  %v1610_v36 = vpop.f32.mrb[7].mxu0  ;;  %v1651_v37 = vpop.f32.mrb[7].mxu1  ;;  %v437_v26 = vrot.slane %v6173_v33, %v6158_v13 }
 0x137   : > { %v3789_v40 = vmul.f32 0.5, %v1608_v5  ;;  %v3791_v41 = vmul.f32 0.5, %v1649_v30 }
 0x138   : > { %5376 = vtanh.f32 %v3788_v34 }
 0x139   : > { %5378 = vtanh.f32 %v3790_v35 }
 0x13a   : > { %v5369_v46 = vpop.eup %5368  ;;  %5380 = vtanh.f32 %v3789_v40 }
 0x13b   : > { %v5371_v47 = vpop.eup %5370  ;;  %v4006_v48 = vmul.f32 0.5, %v5369_v46  ;;  %5382 = vtanh.f32 %v3791_v41  ;;  %v1687_v51 = vpop.f32.mrb[8].mxu0  ;;  %v6209_v46 = vld [vmem:[%s5844_s30 + $0x10] sm:$0xff] }
 0x13c   : > { %v1728_v52 = vpop.f32.mrb[8].mxu1  ;;  %v5373_v55 = vpop.eup %5372  ;;  %v4008_v58 = vmul.f32 0.5, %v5371_v47  ;;  %v1688_v59 = vadd.f32 %v1687_v51, %v409_v42 }
 0x13d   : > { %v1729_v60 = vadd.f32 %v1728_v52, %v417_v43  ;;  %v1689_v61 = vpop.f32.mrb[9].mxu0  ;;  %v1730_v62 = vpop.f32.mrb[9].mxu1  ;;  %v4117_v1 = vadd.f32 0.5, %v4006_v48  ;;  %v4007_v2 = vmul.f32 0.5, %v5373_v55 }
 0x13e   : > { %v5375_v63 = vpop.eup %5374  ;;  %v1690_v3 = vadd.f32 %v1689_v61, %v413_v44  ;;  %v1731_v4 = vadd.f32 %v1730_v62, %v421_v45  ;;  %v1691_v6 = vpop.f32.mrb[10].mxu0  ;;  %v4119_v10 = vadd.f32 0.5, %v4008_v58  ;;  %v3792_v12 = vmul.f32 0.5, %v1688_v59 }
 0x13f   : > { %v1732_v9 = vpop.f32.mrb[10].mxu1  ;;  %v4009_v11 = vmul.f32 0.5, %v5375_v63  ;;  %v3794_v14 = vmul.f32 0.5, %v1729_v60  ;;  %v1692_v15 = vpop.f32.mrb[11].mxu0  ;;  %v4118_v17 = vadd.f32 0.5, %v4007_v2  ;;  %v441_v63 = vrot.slane %v6209_v46, %v6126_v53 }
 0x140   : > { %v1733_v16 = vpop.f32.mrb[11].mxu1  ;;  %v3793_v19 = vmul.f32 0.5, %v1690_v3  ;;  %v3795_v20 = vmul.f32 0.5, %v1731_v4  ;;  %5384 = vtanh.f32 %v3792_v12  ;;  %v445_v3 = vrot.slane %v6209_v46, %v6133_v56 }
 0x141   : > { %v4120_v21 = vadd.f32 0.5, %v4009_v11  ;;  %v4339_v24 = vcombine.low %v4117_v1, %v4118_v17  ;;  %5386 = vtanh.f32 %v3794_v14  ;;  %v449_v1 = vrot.slane %v6209_v46, %v6129_v54 }
 0x142   : > { %v5377_v50 = vpop.eup %5376  ;;  %5388 = vtanh.f32 %v3793_v19  ;;  %v453_v4 = vrot.slane %v6209_v46, %v6136_v57 }
 0x143   : > { %v4340_v27 = vcombine.low %v4119_v10, %v4120_v21  ;;  %v5379_v28 = vpop.eup %5378  ;;  %v4347_v29 = vrot.slane %v4339_v24, %v6190_v18  ;;  %v4010_v5 = vmul.f32 0.5, %v5377_v50  ;;  %5390 = vtanh.f32 %v3795_v20  ;;  %v1769_v30 = vpop.f32.mrb[12].mxu0 }
 0x144   : > { %v1810_v31 = vpop.f32.mrb[12].mxu1  ;;  %v5381_v32 = vpop.eup %5380  ;;  %v4012_v35 = vmul.f32 0.5, %v5379_v28  ;;  %v1770_v36 = vadd.f32 %v1769_v30, %v425_v22 }
 0x145   : > { %v4354_v34 = vrot.slane %v4340_v27, %v6190_v18  ;;  %v1811_v37 = vadd.f32 %v1810_v31, %v433_v23  ;;  %v1771_v38 = vpop.f32.mrb[13].mxu0  ;;  %v1812_v33 = vpop.f32.mrb[13].mxu1  ;;  %v4121_v40 = vadd.f32 0.5, %v4010_v5  ;;  %v4011_v41 = vmul.f32 0.5, %v5381_v32 }
 0x146   : > { %v5383_v39 = vpop.eup %5382  ;;  %v1772_v42 = vadd.f32 %v1771_v38, %v429_v25  ;;  %v1813_v43 = vadd.f32 %v1812_v33, %v437_v26  ;;  %v1773_v44 = vpop.f32.mrb[14].mxu0  ;;  %v4123_v48 = vadd.f32 0.5, %v4012_v35  ;;  %v3796_v51 = vmul.f32 0.5, %v1770_v36 }
 0x147   : > { %v1814_v45 = vpop.f32.mrb[14].mxu1  ;;  %v4355_v47 = vcombine.low %v4347_v29, %v4354_v34  ;;  %v4013_v49 = vmul.f32 0.5, %v5383_v39  ;;  %v1774_v52 = vpop.f32.mrb[15].mxu0  ;;  %v4122_v58 = vadd.f32 0.5, %v4011_v41  ;;  %v3798_v59 = vmul.f32 0.5, %v1811_v37 }
 0x148   : > { %v1815_v55 = vpop.f32.mrb[15].mxu1  ;;  %v3797_v60 = vmul.f32 0.5, %v1772_v42  ;;  %v3799_v61 = vmul.f32 0.5, %v1813_v43  ;;  %5392 = vtanh.f32 %v3796_v51  ;;  %v465_v41 = vrot.slane %v6209_v46, %v6152_v8 }
 0x149   : > { %4842 = vst [vmem:[%s6206_s28] sm:$0xff] %v4355_v47  ;;  %v4124_v62 = vadd.f32 0.5, %v4013_v49  ;;  %v4356_v2 = vcombine.low %v4121_v40, %v4122_v58  ;;  %5394 = vtanh.f32 %v3798_v59  ;;  %v457_v40 = vrot.slane %v6209_v46, %v6149_v7 }
 0x14a   : > { %v5385_v6 = vpop.eup %5384  ;;  %5396 = vtanh.f32 %v3797_v60  ;;  %v461_v43 = vrot.slane %v6209_v46, %v6155_v0  ;;  %v469_v44 = vrot.slane %v6209_v46, %v6158_v13 }
 0x14b   : > { %v4357_v9 = vcombine.low %v4123_v48, %v4124_v62  ;;  %v5387_v10 = vpop.eup %5386  ;;  %v4364_v11 = vrot.slane %v4356_v2, %v6190_v18  ;;  %v4014_v12 = vmul.f32 0.5, %v5385_v6  ;;  %5398 = vtanh.f32 %v3799_v61  ;;  %v1851_v14 = vpop.f32.mrb[16].mxu0 }
 0x14c   : > { %v1892_v15 = vpop.f32.mrb[16].mxu1  ;;  %v5389_v16 = vpop.eup %5388  ;;  %v4016_v19 = vmul.f32 0.5, %v5387_v10  ;;  %v1852_v20 = vadd.f32 %v1851_v14, %v441_v63 }
 0x14d   : > { %v4371_v17 = vrot.slane %v4357_v9, %v6190_v18  ;;  %v1893_v21 = vadd.f32 %v1892_v15, %v449_v1  ;;  %v1853_v22 = vpop.f32.mrb[17].mxu0  ;;  %v1894_v23 = vpop.f32.mrb[17].mxu1  ;;  %v4125_v25 = vadd.f32 0.5, %v4014_v12  ;;  %v4015_v26 = vmul.f32 0.5, %v5389_v16 }
 0x14e   : > { %v5391_v24 = vpop.eup %5390  ;;  %v1854_v50 = vadd.f32 %v1853_v22, %v445_v3  ;;  %v1895_v27 = vadd.f32 %v1894_v23, %v453_v4  ;;  %v1855_v28 = vpop.f32.mrb[18].mxu0  ;;  %v4127_v30 = vadd.f32 0.5, %v4016_v19  ;;  %v3800_v32 = vmul.f32 0.5, %v1852_v20 }
 0x14f   : > { %v1896_v29 = vpop.f32.mrb[18].mxu1  ;;  %v4372_v5 = vcombine.low %v4364_v11, %v4371_v17  ;;  %v4017_v31 = vmul.f32 0.5, %v5391_v24  ;;  %v1856_v34 = vpop.f32.mrb[19].mxu0  ;;  %v4126_v36 = vadd.f32 0.5, %v4015_v26  ;;  %v3802_v37 = vmul.f32 0.5, %v1893_v21  ;;  %v6234_v11 = vld [vmem:[%s5844_s30 + $0x18] sm:$0xff] }
 0x150   : > { %v1897_v35 = vpop.f32.mrb[19].mxu1  ;;  %v3801_v38 = vmul.f32 0.5, %v1854_v50  ;;  %v3803_v33 = vmul.f32 0.5, %v1895_v27  ;;  %5400 = vtanh.f32 %v3800_v32  ;;  %v481_v26 = vrot.slane %v6234_v11, %v6129_v54 }
 0x151   : > { %4843 = vst [vmem:[%s6206_s28 + $0x8] sm:$0xff] %v4372_v5  ;;  %v4128_v39 = vadd.f32 0.5, %v4017_v31  ;;  %v4373_v42 = vcombine.low %v4125_v25, %v4126_v36  ;;  %5402 = vtanh.f32 %v3802_v37  ;;  %v473_v25 = vrot.slane %v6234_v11, %v6126_v53 }
 0x152   : > { %v5393_v45 = vpop.eup %5392  ;;  %5404 = vtanh.f32 %v3801_v38  ;;  %v477_v27 = vrot.slane %v6234_v11, %v6133_v56  ;;  %v485_v28 = vrot.slane %v6234_v11, %v6136_v57 }
 0x153   : > { %v4374_v47 = vcombine.low %v4127_v30, %v4128_v39  ;;  %v5395_v48 = vpop.eup %5394  ;;  %v4381_v49 = vrot.slane %v4373_v42, %v6190_v18  ;;  %v4018_v51 = vmul.f32 0.5, %v5393_v45  ;;  %5406 = vtanh.f32 %v3803_v33  ;;  %v1933_v52 = vpop.f32.mrb[20].mxu0 }
 0x154   : > { %v1974_v55 = vpop.f32.mrb[20].mxu1  ;;  %v5397_v58 = vpop.eup %5396  ;;  %v4020_v60 = vmul.f32 0.5, %v5395_v48  ;;  %v1934_v61 = vadd.f32 %v1933_v52, %v457_v40 }
 0x155   : > { %v4388_v59 = vrot.slane %v4374_v47, %v6190_v18  ;;  %v1975_v62 = vadd.f32 %v1974_v55, %v465_v41  ;;  %v1935_v63 = vpop.f32.mrb[21].mxu0  ;;  %v1976_v1 = vpop.f32.mrb[21].mxu1  ;;  %v4129_v2 = vadd.f32 0.5, %v4018_v51  ;;  %v4019_v3 = vmul.f32 0.5, %v5397_v58 }
 0x156   : > { %v5399_v46 = vpop.eup %5398  ;;  %v1936_v4 = vadd.f32 %v1935_v63, %v461_v43  ;;  %v1977_v6 = vadd.f32 %v1976_v1, %v469_v44  ;;  %v1937_v9 = vpop.f32.mrb[22].mxu0  ;;  %v4131_v14 = vadd.f32 0.5, %v4020_v60  ;;  %v3804_v16 = vmul.f32 0.5, %v1934_v61 }
 0x157   : > { %v1978_v10 = vpop.f32.mrb[22].mxu1  ;;  %v4389_v12 = vcombine.low %v4381_v49, %v4388_v59  ;;  %v4021_v15 = vmul.f32 0.5, %v5399_v46  ;;  %v1938_v17 = vpop.f32.mrb[23].mxu0  ;;  %v4130_v20 = vadd.f32 0.5, %v4019_v3  ;;  %v3806_v21 = vmul.f32 0.5, %v1975_v62 }
 0x158   : > { %v1979_v19 = vpop.f32.mrb[23].mxu1  ;;  %v3805_v22 = vmul.f32 0.5, %v1936_v4  ;;  %v3807_v23 = vmul.f32 0.5, %v1977_v6  ;;  %5408 = vtanh.f32 %v3804_v16  ;;  %v497_v3 = vrot.slane %v6234_v11, %v6152_v8 }
 0x159   : > { %4844 = vst [vmem:[%s6206_s28 + $0x10] sm:$0xff] %v4389_v12  ;;  %v4132_v24 = vadd.f32 0.5, %v4021_v15  ;;  %v4390_v50 = vcombine.low %v4129_v2, %v4130_v20  ;;  %5410 = vtanh.f32 %v3806_v21  ;;  %v489_v2 = vrot.slane %v6234_v11, %v6149_v7 }
 0x15a   : > { %v5401_v29 = vpop.eup %5400  ;;  %5412 = vtanh.f32 %v3805_v22  ;;  %v493_v6 = vrot.slane %v6234_v11, %v6155_v0  ;;  %v501_v9 = vrot.slane %v6234_v11, %v6158_v13 }
 0x15b   : > { %v4391_v5 = vcombine.low %v4131_v14, %v4132_v24  ;;  %v5403_v30 = vpop.eup %5402  ;;  %v4398_v31 = vrot.slane %v4390_v50, %v6190_v18  ;;  %v4022_v32 = vmul.f32 0.5, %v5401_v29  ;;  %5414 = vtanh.f32 %v3807_v23  ;;  %v2015_v34 = vpop.f32.mrb[24].mxu0 }
 0x15c   : > { %v2056_v35 = vpop.f32.mrb[24].mxu1  ;;  %v5405_v36 = vpop.eup %5404  ;;  %v4024_v38 = vmul.f32 0.5, %v5403_v30  ;;  %v2016_v33 = vadd.f32 %v2015_v34, %v473_v25 }
 0x15d   : > { %v4405_v37 = vrot.slane %v4391_v5, %v6190_v18  ;;  %v2057_v39 = vadd.f32 %v2056_v35, %v481_v26  ;;  %v2017_v40 = vpop.f32.mrb[25].mxu0  ;;  %v2058_v41 = vpop.f32.mrb[25].mxu1  ;;  %v4133_v43 = vadd.f32 0.5, %v4022_v32  ;;  %v4023_v44 = vmul.f32 0.5, %v5405_v36 }
 0x15e   : > { %v5407_v42 = vpop.eup %5406  ;;  %v2018_v45 = vadd.f32 %v2017_v40, %v477_v27  ;;  %v2059_v47 = vadd.f32 %v2058_v41, %v485_v28  ;;  %v2019_v48 = vpop.f32.mrb[26].mxu0  ;;  %v4135_v52 = vadd.f32 0.5, %v4024_v38  ;;  %v3808_v58 = vmul.f32 0.5, %v2016_v33 }
 0x15f   : > { %v2060_v49 = vpop.f32.mrb[26].mxu1  ;;  %v4406_v51 = vcombine.low %v4398_v31, %v4405_v37  ;;  %v4025_v55 = vmul.f32 0.5, %v5407_v42  ;;  %v2020_v59 = vpop.f32.mrb[27].mxu0  ;;  %v4134_v61 = vadd.f32 0.5, %v4023_v44  ;;  %v3810_v62 = vmul.f32 0.5, %v2057_v39  ;;  %v6259_v31 = vld [vmem:[%s5844_s30 + $0x20] sm:$0xff] }
 0x160   : > { %v2061_v60 = vpop.f32.mrb[27].mxu1  ;;  %v3809_v63 = vmul.f32 0.5, %v2018_v45  ;;  %v3811_v1 = vmul.f32 0.5, %v2059_v47  ;;  %5416 = vtanh.f32 %v3808_v58  ;;  %v513_v44 = vrot.slane %v6259_v31, %v6129_v54 }
 0x161   : > { %4845 = vst [vmem:[%s6206_s28 + $0x18] sm:$0xff] %v4406_v51  ;;  %v4136_v46 = vadd.f32 0.5, %v4025_v55  ;;  %v4407_v4 = vcombine.low %v4133_v43, %v4134_v61  ;;  %5418 = vtanh.f32 %v3810_v62  ;;  %v505_v43 = vrot.slane %v6259_v31, %v6126_v53 }
 0x162   : > { %v5409_v10 = vpop.eup %5408  ;;  %5420 = vtanh.f32 %v3809_v63  ;;  %v509_v47 = vrot.slane %v6259_v31, %v6133_v56  ;;  %v517_v48 = vrot.slane %v6259_v31, %v6136_v57 }
 0x163   : > { %v4408_v12 = vcombine.low %v4135_v52, %v4136_v46  ;;  %v5411_v14 = vpop.eup %5410  ;;  %v4415_v15 = vrot.slane %v4407_v4, %v6190_v18  ;;  %v4026_v16 = vmul.f32 0.5, %v5409_v10  ;;  %5422 = vtanh.f32 %v3811_v1  ;;  %v2097_v17 = vpop.f32.mrb[28].mxu0 }
 0x164   : > { %v2138_v19 = vpop.f32.mrb[28].mxu1  ;;  %v5413_v20 = vpop.eup %5412  ;;  %v4028_v22 = vmul.f32 0.5, %v5411_v14  ;;  %v2098_v23 = vadd.f32 %v2097_v17, %v489_v2 }
 0x165   : > { %v4422_v21 = vrot.slane %v4408_v12, %v6190_v18  ;;  %v2139_v24 = vadd.f32 %v2138_v19, %v497_v3  ;;  %v2099_v25 = vpop.f32.mrb[29].mxu0  ;;  %v2140_v26 = vpop.f32.mrb[29].mxu1  ;;  %v4137_v50 = vadd.f32 0.5, %v4026_v16  ;;  %v4027_v27 = vmul.f32 0.5, %v5413_v20 }
 0x166   : > { %v5415_v11 = vpop.eup %5414  ;;  %v2100_v28 = vadd.f32 %v2099_v25, %v493_v6  ;;  %v2141_v29 = vadd.f32 %v2140_v26, %v501_v9  ;;  %v2101_v5 = vpop.f32.mrb[30].mxu0  ;;  %v4139_v34 = vadd.f32 0.5, %v4028_v22  ;;  %v3812_v36 = vmul.f32 0.5, %v2098_v23 }
 0x167   : > { %v2142_v30 = vpop.f32.mrb[30].mxu1  ;;  %v4423_v32 = vcombine.low %v4415_v15, %v4422_v21  ;;  %v4029_v35 = vmul.f32 0.5, %v5415_v11  ;;  %v2102_v37 = vpop.f32.mrb[31].mxu0  ;;  %v4138_v33 = vadd.f32 0.5, %v4027_v27  ;;  %v3814_v39 = vmul.f32 0.5, %v2139_v24 }
 0x168   : > { %v2143_v38 = vpop.f32.mrb[31].mxu1  ;;  %v3813_v40 = vmul.f32 0.5, %v2100_v28  ;;  %v3815_v41 = vmul.f32 0.5, %v2141_v29  ;;  %5424 = vtanh.f32 %v3812_v36  ;;  %v529_v27 = vrot.slane %v6259_v31, %v6152_v8 }
 0x169   : > { %4846 = vst [vmem:[%s6206_s28 + $0x20] sm:$0xff] %v4423_v32  ;;  %v4140_v42 = vadd.f32 0.5, %v4029_v35  ;;  %v4424_v45 = vcombine.low %v4137_v50, %v4138_v33  ;;  %5426 = vtanh.f32 %v3814_v39  ;;  %v521_v50 = vrot.slane %v6259_v31, %v6149_v7 }
 0x16a   : > { %v5417_v49 = vpop.eup %5416  ;;  %5428 = vtanh.f32 %v3813_v40  ;;  %v525_v29 = vrot.slane %v6259_v31, %v6155_v0  ;;  %v533_v5 = vrot.slane %v6259_v31, %v6158_v13 }
 0x16b   : > { %v4425_v51 = vcombine.low %v4139_v34, %v4140_v42  ;;  %v5419_v52 = vpop.eup %5418  ;;  %v4432_v55 = vrot.slane %v4424_v45, %v6190_v18  ;;  %v4030_v58 = vmul.f32 0.5, %v5417_v49  ;;  %5430 = vtanh.f32 %v3815_v41  ;;  %v2179_v59 = vpop.f32.mrb[32].mxu0 }
 0x16c   : > { %v2220_v60 = vpop.f32.mrb[32].mxu1  ;;  %v5421_v61 = vpop.eup %5420  ;;  %v4032_v63 = vmul.f32 0.5, %v5419_v52  ;;  %v2180_v1 = vadd.f32 %v2179_v59, %v505_v43 }
 0x16d   : > { %v4439_v62 = vrot.slane %v4425_v51, %v6190_v18  ;;  %v2221_v46 = vadd.f32 %v2220_v60, %v513_v44  ;;  %v2181_v2 = vpop.f32.mrb[33].mxu0  ;;  %v2222_v3 = vpop.f32.mrb[33].mxu1  ;;  %v4141_v6 = vadd.f32 0.5, %v4030_v58  ;;  %v4031_v9 = vmul.f32 0.5, %v5421_v61 }
 0x16e   : > { %v5423_v4 = vpop.eup %5422  ;;  %v2182_v10 = vadd.f32 %v2181_v2, %v509_v47  ;;  %v2223_v12 = vadd.f32 %v2222_v3, %v517_v48  ;;  %v2183_v14 = vpop.f32.mrb[34].mxu0  ;;  %v4143_v17 = vadd.f32 0.5, %v4032_v63  ;;  %v3816_v20 = vmul.f32 0.5, %v2180_v1 }
 0x16f   : > { %v2224_v15 = vpop.f32.mrb[34].mxu1  ;;  %v4440_v16 = vcombine.low %v4432_v55, %v4439_v62  ;;  %v4033_v19 = vmul.f32 0.5, %v5423_v4  ;;  %v2184_v21 = vpop.f32.mrb[35].mxu0  ;;  %v4142_v23 = vadd.f32 0.5, %v4031_v9  ;;  %v3818_v24 = vmul.f32 0.5, %v2221_v46  ;;  %v6284_v55 = vld [vmem:[%s5844_s30 + $0x28] sm:$0xff] }
 0x170   : > { %v2225_v22 = vpop.f32.mrb[35].mxu1  ;;  %v3817_v25 = vmul.f32 0.5, %v2182_v10  ;;  %v3819_v26 = vmul.f32 0.5, %v2223_v12  ;;  %5432 = vtanh.f32 %v3816_v20  ;;  %v545_v9 = vrot.slane %v6284_v55, %v6129_v54 }
 0x171   : > { %4847 = vst [vmem:[%s6206_s28 + $0x28] sm:$0xff] %v4440_v16  ;;  %v4144_v11 = vadd.f32 0.5, %v4033_v19  ;;  %v4441_v28 = vcombine.low %v4141_v6, %v4142_v23  ;;  %5434 = vtanh.f32 %v3818_v24  ;;  %v537_v6 = vrot.slane %v6284_v55, %v6126_v53 }
 0x172   : > { %v5425_v30 = vpop.eup %5424  ;;  %5436 = vtanh.f32 %v3817_v25  ;;  %v541_v12 = vrot.slane %v6284_v55, %v6133_v56  ;;  %v549_v14 = vrot.slane %v6284_v55, %v6136_v57 }
 0x173   : > { %v4442_v32 = vcombine.low %v4143_v17, %v4144_v11  ;;  %v5427_v34 = vpop.eup %5426  ;;  %v4449_v35 = vrot.slane %v4441_v28, %v6190_v18  ;;  %v4034_v36 = vmul.f32 0.5, %v5425_v30  ;;  %5438 = vtanh.f32 %v3819_v26  ;;  %v2261_v37 = vpop.f32.mrb[36].mxu0 }
 0x174   : > { %v2302_v38 = vpop.f32.mrb[36].mxu1  ;;  %v5429_v33 = vpop.eup %5428  ;;  %v4036_v40 = vmul.f32 0.5, %v5427_v34  ;;  %v2262_v41 = vadd.f32 %v2261_v37, %v521_v50 }
 0x175   : > { %v4456_v39 = vrot.slane %v4442_v32, %v6190_v18  ;;  %v2303_v42 = vadd.f32 %v2302_v38, %v529_v27  ;;  %v2263_v43 = vpop.f32.mrb[37].mxu0  ;;  %v2304_v44 = vpop.f32.mrb[37].mxu1  ;;  %v4145_v45 = vadd.f32 0.5, %v4034_v36  ;;  %v4035_v47 = vmul.f32 0.5, %v5429_v33 }
 0x176   : > { %v5431_v31 = vpop.eup %5430  ;;  %v2264_v48 = vadd.f32 %v2263_v43, %v525_v29  ;;  %v2305_v49 = vadd.f32 %v2304_v44, %v533_v5  ;;  %v2265_v51 = vpop.f32.mrb[38].mxu0  ;;  %v4147_v59 = vadd.f32 0.5, %v4036_v40  ;;  %v3820_v61 = vmul.f32 0.5, %v2262_v41 }
 0x177   : > { %v2306_v52 = vpop.f32.mrb[38].mxu1  ;;  %v4457_v58 = vcombine.low %v4449_v35, %v4456_v39  ;;  %v4037_v60 = vmul.f32 0.5, %v5431_v31  ;;  %v2266_v62 = vpop.f32.mrb[39].mxu0  ;;  %v4146_v1 = vadd.f32 0.5, %v4035_v47  ;;  %v3822_v46 = vmul.f32 0.5, %v2303_v42 }
 0x178   : > { %v2307_v63 = vpop.f32.mrb[39].mxu1  ;;  %v3821_v2 = vmul.f32 0.5, %v2264_v48  ;;  %v3823_v3 = vmul.f32 0.5, %v2305_v49  ;;  %5440 = vtanh.f32 %v3820_v61  ;;  %v561_v47 = vrot.slane %v6284_v55, %v6152_v8 }
 0x179   : > { %4848 = vst [vmem:[%s6206_s28 + $0x30] sm:$0xff] %v4457_v58  ;;  %v4148_v4 = vadd.f32 0.5, %v4037_v60  ;;  %v4458_v10 = vcombine.low %v4145_v45, %v4146_v1  ;;  %5442 = vtanh.f32 %v3822_v46  ;;  %v553_v45 = vrot.slane %v6284_v55, %v6149_v7 }
 0x17a   : > { %v5433_v15 = vpop.eup %5432  ;;  %5444 = vtanh.f32 %v3821_v2  ;;  %v557_v49 = vrot.slane %v6284_v55, %v6155_v0  ;;  %v565_v51 = vrot.slane %v6284_v55, %v6158_v13 }
 0x17b   : > { %v4459_v16 = vcombine.low %v4147_v59, %v4148_v4  ;;  %v5435_v17 = vpop.eup %5434  ;;  %v4466_v19 = vrot.slane %v4458_v10, %v6190_v18  ;;  %v4038_v20 = vmul.f32 0.5, %v5433_v15  ;;  %5446 = vtanh.f32 %v3823_v3  ;;  %v2343_v21 = vpop.f32.mrb[40].mxu0 }
 0x17c   : > { %v2384_v22 = vpop.f32.mrb[40].mxu1  ;;  %v5437_v23 = vpop.eup %5436  ;;  %v4040_v25 = vmul.f32 0.5, %v5435_v17  ;;  %v2344_v26 = vadd.f32 %v2343_v21, %v537_v6 }
 0x17d   : > { %v4473_v24 = vrot.slane %v4459_v16, %v6190_v18  ;;  %v2385_v11 = vadd.f32 %v2384_v22, %v545_v9  ;;  %v2345_v50 = vpop.f32.mrb[41].mxu0  ;;  %v2386_v27 = vpop.f32.mrb[41].mxu1  ;;  %v4149_v29 = vadd.f32 0.5, %v4038_v20  ;;  %v4039_v5 = vmul.f32 0.5, %v5437_v23 }
 0x17e   : > { %v5439_v28 = vpop.eup %5438  ;;  %v2346_v30 = vadd.f32 %v2345_v50, %v541_v12  ;;  %v2387_v32 = vadd.f32 %v2386_v27, %v549_v14  ;;  %v2347_v34 = vpop.f32.mrb[42].mxu0  ;;  %v4151_v37 = vadd.f32 0.5, %v4040_v25  ;;  %v3824_v33 = vmul.f32 0.5, %v2344_v26 }
 0x17f   : > { %v2388_v35 = vpop.f32.mrb[42].mxu1  ;;  %v4474_v36 = vcombine.low %v4466_v19, %v4473_v24  ;;  %v4041_v38 = vmul.f32 0.5, %v5439_v28  ;;  %v2348_v39 = vpop.f32.mrb[43].mxu0  ;;  %v4150_v41 = vadd.f32 0.5, %v4039_v5  ;;  %v3826_v42 = vmul.f32 0.5, %v2385_v11  ;;  %v6309_v19 = vld [vmem:[%s5844_s30 + $0x30] sm:$0xff] }
 0x180   : > { %v2389_v40 = vpop.f32.mrb[43].mxu1  ;;  %v3825_v43 = vmul.f32 0.5, %v2346_v30  ;;  %v3827_v44 = vmul.f32 0.5, %v2387_v32  ;;  %5448 = vtanh.f32 %v3824_v33  ;;  %v577_v5 = vrot.slane %v6309_v19, %v6129_v54 }
 0x181   : > { %4849 = vst [vmem:[%s6206_s28 + $0x38] sm:$0xff] %v4474_v36  ;;  %v4152_v31 = vadd.f32 0.5, %v4041_v38  ;;  %v4475_v48 = vcombine.low %v4149_v29, %v4150_v41  ;;  %5450 = vtanh.f32 %v3826_v42  ;;  %v569_v29 = vrot.slane %v6309_v19, %v6126_v53 }
 0x182   : > { %v5441_v52 = vpop.eup %5440  ;;  %5452 = vtanh.f32 %v3825_v43  ;;  %v573_v32 = vrot.slane %v6309_v19, %v6133_v56  ;;  %v581_v34 = vrot.slane %v6309_v19, %v6136_v57 }
 0x183   : > { %v4476_v58 = vcombine.low %v4151_v37, %v4152_v31  ;;  %v5443_v59 = vpop.eup %5442  ;;  %v4483_v60 = vrot.slane %v4475_v48, %v6190_v18  ;;  %v4042_v61 = vmul.f32 0.5, %v5441_v52  ;;  %5454 = vtanh.f32 %v3827_v44  ;;  %v2425_v62 = vpop.f32.mrb[44].mxu0 }
 0x184   : > { %v2466_v63 = vpop.f32.mrb[44].mxu1  ;;  %v5445_v1 = vpop.eup %5444  ;;  %v4044_v2 = vmul.f32 0.5, %v5443_v59  ;;  %v2426_v3 = vadd.f32 %v2425_v62, %v553_v45 }
 0x185   : > { %v4490_v46 = vrot.slane %v4476_v58, %v6190_v18  ;;  %v2467_v4 = vadd.f32 %v2466_v63, %v561_v47  ;;  %v2427_v6 = vpop.f32.mrb[45].mxu0  ;;  %v2468_v9 = vpop.f32.mrb[45].mxu1  ;;  %v4153_v10 = vadd.f32 0.5, %v4042_v61  ;;  %v4043_v12 = vmul.f32 0.5, %v5445_v1 }
 0x186   : > { %v5447_v55 = vpop.eup %5446  ;;  %v2428_v14 = vadd.f32 %v2427_v6, %v557_v49  ;;  %v2469_v15 = vadd.f32 %v2468_v9, %v565_v51  ;;  %v2429_v16 = vpop.f32.mrb[46].mxu0  ;;  %v4155_v21 = vadd.f32 0.5, %v4044_v2  ;;  %v3828_v23 = vmul.f32 0.5, %v2426_v3 }
 0x187   : > { %v2470_v17 = vpop.f32.mrb[46].mxu1  ;;  %v4491_v20 = vcombine.low %v4483_v60, %v4490_v46  ;;  %v4045_v22 = vmul.f32 0.5, %v5447_v55  ;;  %v2430_v24 = vpop.f32.mrb[47].mxu0  ;;  %v4154_v26 = vadd.f32 0.5, %v4043_v12  ;;  %v3830_v11 = vmul.f32 0.5, %v2467_v4 }
 0x188   : > { %v2471_v25 = vpop.f32.mrb[47].mxu1  ;;  %v3829_v50 = vmul.f32 0.5, %v2428_v14  ;;  %v3831_v27 = vmul.f32 0.5, %v2469_v15  ;;  %5456 = vtanh.f32 %v3828_v23  ;;  %v593_v12 = vrot.slane %v6309_v19, %v6152_v8 }
 0x189   : > { %4850 = vst [vmem:[%s6206_s28 + $0x40] sm:$0xff] %v4491_v20  ;;  %v4156_v28 = vadd.f32 0.5, %v4045_v22  ;;  %v4492_v30 = vcombine.low %v4153_v10, %v4154_v26  ;;  %5458 = vtanh.f32 %v3830_v11  ;;  %v585_v10 = vrot.slane %v6309_v19, %v6149_v7 }
 0x18a   : > { %v5449_v35 = vpop.eup %5448  ;;  %5460 = vtanh.f32 %v3829_v50  ;;  %v589_v15 = vrot.slane %v6309_v19, %v6155_v0  ;;  %v597_v16 = vrot.slane %v6309_v19, %v6158_v13 }
 0x18b   : > { %v4493_v36 = vcombine.low %v4155_v21, %v4156_v28  ;;  %v5451_v37 = vpop.eup %5450  ;;  %v4500_v38 = vrot.slane %v4492_v30, %v6190_v18  ;;  %v4046_v33 = vmul.f32 0.5, %v5449_v35  ;;  %5462 = vtanh.f32 %v3831_v27  ;;  %v2507_v39 = vpop.f32.mrb[48].mxu0 }
 0x18c   : > { %v2548_v40 = vpop.f32.mrb[48].mxu1  ;;  %v5453_v41 = vpop.eup %5452  ;;  %v4048_v43 = vmul.f32 0.5, %v5451_v37  ;;  %v2508_v44 = vadd.f32 %v2507_v39, %v569_v29 }
 0x18d   : > { %v4507_v42 = vrot.slane %v4493_v36, %v6190_v18  ;;  %v2549_v31 = vadd.f32 %v2548_v40, %v577_v5  ;;  %v2509_v45 = vpop.f32.mrb[49].mxu0  ;;  %v2550_v47 = vpop.f32.mrb[49].mxu1  ;;  %v4157_v49 = vadd.f32 0.5, %v4046_v33  ;;  %v4047_v51 = vmul.f32 0.5, %v5453_v41 }
 0x18e   : > { %v5455_v48 = vpop.eup %5454  ;;  %v2510_v52 = vadd.f32 %v2509_v45, %v573_v32  ;;  %v2551_v58 = vadd.f32 %v2550_v47, %v581_v34  ;;  %v2511_v59 = vpop.f32.mrb[50].mxu0  ;;  %v4159_v62 = vadd.f32 0.5, %v4048_v43  ;;  %v3832_v1 = vmul.f32 0.5, %v2508_v44 }
 0x18f   : > { %v2552_v60 = vpop.f32.mrb[50].mxu1  ;;  %v4508_v61 = vcombine.low %v4500_v38, %v4507_v42  ;;  %v4049_v63 = vmul.f32 0.5, %v5455_v48  ;;  %v2512_v46 = vpop.f32.mrb[51].mxu0  ;;  %v4158_v3 = vadd.f32 0.5, %v4047_v51  ;;  %v3834_v4 = vmul.f32 0.5, %v2549_v31  ;;  %v6334_v38 = vld [vmem:[%s5844_s30 + $0x38] sm:$0xff] }
 0x190   : > { %v2553_v2 = vpop.f32.mrb[51].mxu1  ;;  %v3833_v6 = vmul.f32 0.5, %v2510_v52  ;;  %v3835_v9 = vmul.f32 0.5, %v2551_v58  ;;  %5464 = vtanh.f32 %v3832_v1  ;;  %v609_v51 = vrot.slane %v6334_v38, %v6129_v54 }
 0x191   : > { %4851 = vst [vmem:[%s6206_s28 + $0x48] sm:$0xff] %v4508_v61  ;;  %v4160_v55 = vadd.f32 0.5, %v4049_v63  ;;  %v4509_v14 = vcombine.low %v4157_v49, %v4158_v3  ;;  %5466 = vtanh.f32 %v3834_v4  ;;  %v601_v49 = vrot.slane %v6334_v38, %v6126_v53 }
 0x192   : > { %v5457_v17 = vpop.eup %5456  ;;  %5468 = vtanh.f32 %v3833_v6  ;;  %v605_v58 = vrot.slane %v6334_v38, %v6133_v56  ;;  %v613_v59 = vrot.slane %v6334_v38, %v6136_v57 }
 0x193   : > { %v4510_v20 = vcombine.low %v4159_v62, %v4160_v55  ;;  %v5459_v21 = vpop.eup %5458  ;;  %v4517_v22 = vrot.slane %v4509_v14, %v6190_v18  ;;  %v4050_v23 = vmul.f32 0.5, %v5457_v17  ;;  %5470 = vtanh.f32 %v3835_v9  ;;  %v2589_v24 = vpop.f32.mrb[52].mxu0 }
 0x194   : > { %v2630_v25 = vpop.f32.mrb[52].mxu1  ;;  %v5461_v26 = vpop.eup %5460  ;;  %v4052_v50 = vmul.f32 0.5, %v5459_v21  ;;  %v2590_v27 = vadd.f32 %v2589_v24, %v585_v10 }
 0x195   : > { %v4524_v11 = vrot.slane %v4510_v20, %v6190_v18  ;;  %v2631_v28 = vadd.f32 %v2630_v25, %v593_v12  ;;  %v2591_v29 = vpop.f32.mrb[53].mxu0  ;;  %v2632_v5 = vpop.f32.mrb[53].mxu1  ;;  %v4161_v30 = vadd.f32 0.5, %v4050_v23  ;;  %v4051_v32 = vmul.f32 0.5, %v5461_v26 }
 0x196   : > { %v5463_v19 = vpop.eup %5462  ;;  %v2592_v34 = vadd.f32 %v2591_v29, %v589_v15  ;;  %v2633_v35 = vadd.f32 %v2632_v5, %v597_v16  ;;  %v2593_v36 = vpop.f32.mrb[54].mxu0  ;;  %v4163_v39 = vadd.f32 0.5, %v4052_v50  ;;  %v3836_v41 = vmul.f32 0.5, %v2590_v27 }
 0x197   : > { %v2634_v37 = vpop.f32.mrb[54].mxu1  ;;  %v4525_v33 = vcombine.low %v4517_v22, %v4524_v11  ;;  %v4053_v40 = vmul.f32 0.5, %v5463_v19  ;;  %v2594_v42 = vpop.f32.mrb[55].mxu0  ;;  %v4162_v44 = vadd.f32 0.5, %v4051_v32  ;;  %v3838_v31 = vmul.f32 0.5, %v2631_v28 }
 0x198   : > { %v2635_v43 = vpop.f32.mrb[55].mxu1  ;;  %v3837_v45 = vmul.f32 0.5, %v2592_v34  ;;  %v3839_v47 = vmul.f32 0.5, %v2633_v35  ;;  %5472 = vtanh.f32 %v3836_v41  ;;  %v625_v32 = vrot.slane %v6334_v38, %v6152_v8 }
 0x199   : > { %4852 = vst [vmem:[%s6206_s28 + $0x50] sm:$0xff] %v4525_v33  ;;  %v4164_v48 = vadd.f32 0.5, %v4053_v40  ;;  %v4526_v52 = vcombine.low %v4161_v30, %v4162_v44  ;;  %5474 = vtanh.f32 %v3838_v31  ;;  %v617_v30 = vrot.slane %v6334_v38, %v6149_v7 }
 0x19a   : > { %v5465_v60 = vpop.eup %5464  ;;  %5476 = vtanh.f32 %v3837_v45  ;;  %v621_v35 = vrot.slane %v6334_v38, %v6155_v0  ;;  %v629_v36 = vrot.slane %v6334_v38, %v6158_v13 }
 0x19b   : > { %v4527_v61 = vcombine.low %v4163_v39, %v4164_v48  ;;  %v5467_v62 = vpop.eup %5466  ;;  %v4534_v63 = vrot.slane %v4526_v52, %v6190_v18  ;;  %v4054_v1 = vmul.f32 0.5, %v5465_v60  ;;  %5478 = vtanh.f32 %v3839_v47  ;;  %v2671_v46 = vpop.f32.mrb[56].mxu0 }
 0x19c   : > { %v2712_v2 = vpop.f32.mrb[56].mxu1  ;;  %v5469_v3 = vpop.eup %5468  ;;  %v4056_v6 = vmul.f32 0.5, %v5467_v62  ;;  %v2672_v9 = vadd.f32 %v2671_v46, %v601_v49 }
 0x19d   : > { %v4541_v4 = vrot.slane %v4527_v61, %v6190_v18  ;;  %v2713_v55 = vadd.f32 %v2712_v2, %v609_v51  ;;  %v2673_v10 = vpop.f32.mrb[57].mxu0  ;;  %v2714_v12 = vpop.f32.mrb[57].mxu1  ;;  %v4165_v15 = vadd.f32 0.5, %v4054_v1  ;;  %v4055_v16 = vmul.f32 0.5, %v5469_v3 }
 0x19e   : > { %v5471_v14 = vpop.eup %5470  ;;  %v2674_v17 = vadd.f32 %v2673_v10, %v605_v58  ;;  %v2715_v20 = vadd.f32 %v2714_v12, %v613_v59  ;;  %v2675_v21 = vpop.f32.mrb[58].mxu0  ;;  %v4167_v24 = vadd.f32 0.5, %v4056_v6  ;;  %v3840_v26 = vmul.f32 0.5, %v2672_v9 }
 0x19f   : > { %v2716_v22 = vpop.f32.mrb[58].mxu1  ;;  %v4542_v23 = vcombine.low %v4534_v63, %v4541_v4  ;;  %v4057_v25 = vmul.f32 0.5, %v5471_v14  ;;  %v2676_v11 = vpop.f32.mrb[59].mxu0  ;;  %v4166_v27 = vadd.f32 0.5, %v4055_v16  ;;  %v3842_v28 = vmul.f32 0.5, %v2713_v55  ;;  %v6359_v63 = vld [vmem:[%s5844_s30 + $0x40] sm:$0xff] }
 0x1a0   : > { %v2717_v50 = vpop.f32.mrb[59].mxu1  ;;  %v3841_v29 = vmul.f32 0.5, %v2674_v17  ;;  %v3843_v5 = vmul.f32 0.5, %v2715_v20  ;;  %5480 = vtanh.f32 %v3840_v26  ;;  %v641_v16 = vrot.slane %v6359_v63, %v6129_v54 }
 0x1a1   : > { %4853 = vst [vmem:[%s6206_s28 + $0x58] sm:$0xff] %v4542_v23  ;;  %v4168_v19 = vadd.f32 0.5, %v4057_v25  ;;  %v4543_v34 = vcombine.low %v4165_v15, %v4166_v27  ;;  %5482 = vtanh.f32 %v3842_v28  ;;  %v633_v15 = vrot.slane %v6359_v63, %v6126_v53 }
 0x1a2   : > { %v5473_v37 = vpop.eup %5472  ;;  %5484 = vtanh.f32 %v3841_v29  ;;  %v637_v20 = vrot.slane %v6359_v63, %v6133_v56  ;;  %v645_v21 = vrot.slane %v6359_v63, %v6136_v57 }
 0x1a3   : > { %v4544_v33 = vcombine.low %v4167_v24, %v4168_v19  ;;  %v5475_v39 = vpop.eup %5474  ;;  %v4551_v40 = vrot.slane %v4543_v34, %v6190_v18  ;;  %v4058_v41 = vmul.f32 0.5, %v5473_v37  ;;  %5486 = vtanh.f32 %v3843_v5  ;;  %v2753_v42 = vpop.f32.mrb[60].mxu0 }
 0x1a4   : > { %v2794_v43 = vpop.f32.mrb[60].mxu1  ;;  %v5477_v44 = vpop.eup %5476  ;;  %v4060_v45 = vmul.f32 0.5, %v5475_v39  ;;  %v2754_v47 = vadd.f32 %v2753_v42, %v617_v30 }
 0x1a5   : > { %v4558_v31 = vrot.slane %v4544_v33, %v6190_v18  ;;  %v2795_v48 = vadd.f32 %v2794_v43, %v625_v32  ;;  %v2755_v49 = vpop.f32.mrb[61].mxu0  ;;  %v2796_v51 = vpop.f32.mrb[61].mxu1  ;;  %v4169_v52 = vadd.f32 0.5, %v4058_v41  ;;  %v4059_v58 = vmul.f32 0.5, %v5477_v44 }
 0x1a6   : > { %v5479_v38 = vpop.eup %5478  ;;  %v2756_v59 = vadd.f32 %v2755_v49, %v621_v35  ;;  %v2797_v60 = vadd.f32 %v2796_v51, %v629_v36  ;;  %v2757_v61 = vpop.f32.mrb[62].mxu0  ;;  %v4171_v46 = vadd.f32 0.5, %v4060_v45  ;;  %v3844_v3 = vmul.f32 0.5, %v2754_v47 }
 0x1a7   : > { %v2798_v62 = vpop.f32.mrb[62].mxu1  ;;  %v4559_v1 = vcombine.low %v4551_v40, %v4558_v31  ;;  %v4061_v2 = vmul.f32 0.5, %v5479_v38  ;;  %v2758_v4 = vpop.f32.mrb[63].mxu0  ;;  %v4170_v9 = vadd.f32 0.5, %v4059_v58  ;;  %v3846_v55 = vmul.f32 0.5, %v2795_v48 }
 0x1a8   : > { %v2799_v6 = vpop.f32.mrb[63].mxu1  ;;  %v3845_v10 = vmul.f32 0.5, %v2756_v59  ;;  %v3847_v12 = vmul.f32 0.5, %v2797_v60  ;;  %5488 = vtanh.f32 %v3844_v3  ;;  %v657_v58 = vrot.slane %v6359_v63, %v6152_v8 }
 0x1a9   : > { %4854 = vst [vmem:[%s6206_s28 + $0x60] sm:$0xff] %v4559_v1  ;;  %v4172_v14 = vadd.f32 0.5, %v4061_v2  ;;  %v4560_v17 = vcombine.low %v4169_v52, %v4170_v9  ;;  %5490 = vtanh.f32 %v3846_v55  ;;  %v649_v52 = vrot.slane %v6359_v63, %v6149_v7 }
 0x1aa   : > { %v5481_v22 = vpop.eup %5480  ;;  %5492 = vtanh.f32 %v3845_v10  ;;  %v653_v60 = vrot.slane %v6359_v63, %v6155_v0  ;;  %v661_v61 = vrot.slane %v6359_v63, %v6158_v13 }
 0x1ab   : > { %v4561_v23 = vcombine.low %v4171_v46, %v4172_v14  ;;  %v5483_v24 = vpop.eup %5482  ;;  %v4568_v25 = vrot.slane %v4560_v17, %v6190_v18  ;;  %v4062_v26 = vmul.f32 0.5, %v5481_v22  ;;  %5494 = vtanh.f32 %v3847_v12  ;;  %v2835_v11 = vpop.f32.mrb[64].mxu0 }
 0x1ac   : > { %v2876_v50 = vpop.f32.mrb[64].mxu1  ;;  %v5485_v27 = vpop.eup %5484  ;;  %v4064_v29 = vmul.f32 0.5, %v5483_v24  ;;  %v2836_v5 = vadd.f32 %v2835_v11, %v633_v15 }
 0x1ad   : > { %v4575_v28 = vrot.slane %v4561_v23, %v6190_v18  ;;  %v2877_v19 = vadd.f32 %v2876_v50, %v641_v16  ;;  %v2837_v30 = vpop.f32.mrb[65].mxu0  ;;  %v2878_v32 = vpop.f32.mrb[65].mxu1  ;;  %v4173_v35 = vadd.f32 0.5, %v4062_v26  ;;  %v4063_v36 = vmul.f32 0.5, %v5485_v27 }
 0x1ae   : > { %v5487_v34 = vpop.eup %5486  ;;  %v2838_v37 = vadd.f32 %v2837_v30, %v637_v20  ;;  %v2879_v33 = vadd.f32 %v2878_v32, %v645_v21  ;;  %v2839_v39 = vpop.f32.mrb[66].mxu0  ;;  %v4175_v42 = vadd.f32 0.5, %v4064_v29  ;;  %v3848_v44 = vmul.f32 0.5, %v2836_v5 }
 0x1af   : > { %v2880_v40 = vpop.f32.mrb[66].mxu1  ;;  %v4576_v41 = vcombine.low %v4568_v25, %v4575_v28  ;;  %v4065_v43 = vmul.f32 0.5, %v5487_v34  ;;  %v2840_v31 = vpop.f32.mrb[67].mxu0  ;;  %v4174_v47 = vadd.f32 0.5, %v4063_v36  ;;  %v3850_v48 = vmul.f32 0.5, %v2877_v19  ;;  %v6384_v25 = vld [vmem:[%s5844_s30 + $0x48] sm:$0xff] }
 0x1b0   : > { %v2881_v45 = vpop.f32.mrb[67].mxu1  ;;  %v3849_v49 = vmul.f32 0.5, %v2838_v37  ;;  %v3851_v51 = vmul.f32 0.5, %v2879_v33  ;;  %5496 = vtanh.f32 %v3848_v44  ;;  %v673_v36 = vrot.slane %v6384_v25, %v6129_v54 }
 0x1b1   : > { %4855 = vst [vmem:[%s6206_s28 + $0x68] sm:$0xff] %v4576_v41  ;;  %v4176_v38 = vadd.f32 0.5, %v4065_v43  ;;  %v4577_v59 = vcombine.low %v4173_v35, %v4174_v47  ;;  %5498 = vtanh.f32 %v3850_v48  ;;  %v665_v35 = vrot.slane %v6384_v25, %v6126_v53 }
 0x1b2   : > { %v5489_v62 = vpop.eup %5488  ;;  %5500 = vtanh.f32 %v3849_v49  ;;  %v669_v33 = vrot.slane %v6384_v25, %v6133_v56  ;;  %v677_v39 = vrot.slane %v6384_v25, %v6136_v57 }
 0x1b3   : > { %v4578_v1 = vcombine.low %v4175_v42, %v4176_v38  ;;  %v5491_v46 = vpop.eup %5490  ;;  %v4585_v2 = vrot.slane %v4577_v59, %v6190_v18  ;;  %v4066_v3 = vmul.f32 0.5, %v5489_v62  ;;  %5502 = vtanh.f32 %v3851_v51  ;;  %v2917_v4 = vpop.f32.mrb[68].mxu0 }
 0x1b4   : > { %v2958_v6 = vpop.f32.mrb[68].mxu1  ;;  %v5493_v9 = vpop.eup %5492  ;;  %v4068_v10 = vmul.f32 0.5, %v5491_v46  ;;  %v2918_v12 = vadd.f32 %v2917_v4, %v649_v52 }
 0x1b5   : > { %v4592_v55 = vrot.slane %v4578_v1, %v6190_v18  ;;  %v2959_v14 = vadd.f32 %v2958_v6, %v657_v58  ;;  %v2919_v15 = vpop.f32.mrb[69].mxu0  ;;  %v2960_v16 = vpop.f32.mrb[69].mxu1  ;;  %v4177_v17 = vadd.f32 0.5, %v4066_v3  ;;  %v4067_v20 = vmul.f32 0.5, %v5493_v9 }
 0x1b6   : > { %v5495_v63 = vpop.eup %5494  ;;  %v2920_v21 = vadd.f32 %v2919_v15, %v653_v60  ;;  %v2961_v22 = vadd.f32 %v2960_v16, %v661_v61  ;;  %v2921_v23 = vpop.f32.mrb[70].mxu0  ;;  %v4179_v11 = vadd.f32 0.5, %v4068_v10  ;;  %v3852_v27 = vmul.f32 0.5, %v2918_v12 }
 0x1b7   : > { %v2962_v24 = vpop.f32.mrb[70].mxu1  ;;  %v4593_v26 = vcombine.low %v4585_v2, %v4592_v55  ;;  %v4069_v50 = vmul.f32 0.5, %v5495_v63  ;;  %v2922_v28 = vpop.f32.mrb[71].mxu0  ;;  %v4178_v5 = vadd.f32 0.5, %v4067_v20  ;;  %v3854_v19 = vmul.f32 0.5, %v2959_v14 }
 0x1b8   : > { %v2963_v29 = vpop.f32.mrb[71].mxu1  ;;  %v3853_v30 = vmul.f32 0.5, %v2920_v21  ;;  %v3855_v32 = vmul.f32 0.5, %v2961_v22  ;;  %5504 = vtanh.f32 %v3852_v27  ;;  %v689_v20 = vrot.slane %v6384_v25, %v6152_v8 }
 0x1b9   : > { %4856 = vst [vmem:[%s6206_s28 + $0x70] sm:$0xff] %v4593_v26  ;;  %v4180_v34 = vadd.f32 0.5, %v4069_v50  ;;  %v4594_v37 = vcombine.low %v4177_v17, %v4178_v5  ;;  %5506 = vtanh.f32 %v3854_v19  ;;  %v681_v17 = vrot.slane %v6384_v25, %v6149_v7 }
 0x1ba   : > { %v5497_v40 = vpop.eup %5496  ;;  %5508 = vtanh.f32 %v3853_v30  ;;  %v685_v22 = vrot.slane %v6384_v25, %v6155_v0  ;;  %v693_v23 = vrot.slane %v6384_v25, %v6158_v13 }
 0x1bb   : > { %v4595_v41 = vcombine.low %v4179_v11, %v4180_v34  ;;  %v5499_v42 = vpop.eup %5498  ;;  %v4602_v43 = vrot.slane %v4594_v37, %v6190_v18  ;;  %v4070_v44 = vmul.f32 0.5, %v5497_v40  ;;  %5510 = vtanh.f32 %v3855_v32  ;;  %v2999_v31 = vpop.f32.mrb[72].mxu0 }
 0x1bc   : > { %v3040_v45 = vpop.f32.mrb[72].mxu1  ;;  %v5501_v47 = vpop.eup %5500  ;;  %v4072_v49 = vmul.f32 0.5, %v5499_v42  ;;  %v3000_v51 = vadd.f32 %v2999_v31, %v665_v35 }
 0x1bd   : > { %v4609_v48 = vrot.slane %v4595_v41, %v6190_v18  ;;  %v3041_v38 = vadd.f32 %v3040_v45, %v673_v36  ;;  %v3001_v52 = vpop.f32.mrb[73].mxu0  ;;  %v3042_v58 = vpop.f32.mrb[73].mxu1  ;;  %v4181_v60 = vadd.f32 0.5, %v4070_v44  ;;  %v4071_v61 = vmul.f32 0.5, %v5501_v47 }
 0x1be   : > { %v5503_v59 = vpop.eup %5502  ;;  %v3002_v62 = vadd.f32 %v3001_v52, %v669_v33  ;;  %v3043_v1 = vadd.f32 %v3042_v58, %v677_v39  ;;  %v3003_v46 = vpop.f32.mrb[74].mxu0  ;;  %v4183_v4 = vadd.f32 0.5, %v4072_v49  ;;  %v3856_v9 = vmul.f32 0.5, %v3000_v51 }
 0x1bf   : > { %v3044_v2 = vpop.f32.mrb[74].mxu1  ;;  %v4610_v3 = vcombine.low %v4602_v43, %v4609_v48  ;;  %v4073_v6 = vmul.f32 0.5, %v5503_v59  ;;  %v3004_v55 = vpop.f32.mrb[75].mxu0  ;;  %v4182_v12 = vadd.f32 0.5, %v4071_v61  ;;  %v3858_v14 = vmul.f32 0.5, %v3041_v38  ;;  %v6409_v43 = vld [vmem:[%s5844_s30 + $0x50] sm:$0xff] }
 0x1c0   : > { %v3045_v10 = vpop.f32.mrb[75].mxu1  ;;  %v3857_v15 = vmul.f32 0.5, %v3002_v62  ;;  %v3859_v16 = vmul.f32 0.5, %v3043_v1  ;;  %5512 = vtanh.f32 %v3856_v9  ;;  %v705_v61 = vrot.slane %v6409_v43, %v6129_v54 }
 0x1c1   : > { %4857 = vst [vmem:[%s6206_s28 + $0x78] sm:$0xff] %v4610_v3  ;;  %v4184_v63 = vadd.f32 0.5, %v4073_v6  ;;  %v4611_v21 = vcombine.low %v4181_v60, %v4182_v12  ;;  %5514 = vtanh.f32 %v3858_v14  ;;  %v697_v60 = vrot.slane %v6409_v43, %v6126_v53 }
 0x1c2   : > { %v5505_v24 = vpop.eup %5504  ;;  %5516 = vtanh.f32 %v3857_v15  ;;  %v701_v1 = vrot.slane %v6409_v43, %v6133_v56  ;;  %v709_v46 = vrot.slane %v6409_v43, %v6136_v57 }
 0x1c3   : > { %v4612_v26 = vcombine.low %v4183_v4, %v4184_v63  ;;  %v5507_v11 = vpop.eup %5506  ;;  %v4619_v50 = vrot.slane %v4611_v21, %v6190_v18  ;;  %v4074_v27 = vmul.f32 0.5, %v5505_v24  ;;  %5518 = vtanh.f32 %v3859_v16  ;;  %v3081_v28 = vpop.f32.mrb[76].mxu0 }
 0x1c4   : > { %v3122_v29 = vpop.f32.mrb[76].mxu1  ;;  %v5509_v5 = vpop.eup %5508  ;;  %v4076_v30 = vmul.f32 0.5, %v5507_v11  ;;  %v3082_v32 = vadd.f32 %v3081_v28, %v681_v17 }
 0x1c5   : > { %v4626_v19 = vrot.slane %v4612_v26, %v6190_v18  ;;  %v3123_v34 = vadd.f32 %v3122_v29, %v689_v20  ;;  %v3083_v35 = vpop.f32.mrb[77].mxu0  ;;  %v3124_v36 = vpop.f32.mrb[77].mxu1  ;;  %v4185_v37 = vadd.f32 0.5, %v4074_v27  ;;  %v4075_v33 = vmul.f32 0.5, %v5509_v5 }
 0x1c6   : > { %v5511_v25 = vpop.eup %5510  ;;  %v3084_v39 = vadd.f32 %v3083_v35, %v685_v22  ;;  %v3125_v40 = vadd.f32 %v3124_v36, %v693_v23  ;;  %v3085_v41 = vpop.f32.mrb[78].mxu0  ;;  %v4187_v31 = vadd.f32 0.5, %v4076_v30  ;;  %v3860_v47 = vmul.f32 0.5, %v3082_v32 }
 0x1c7   : > { %v3126_v42 = vpop.f32.mrb[78].mxu1  ;;  %v4627_v44 = vcombine.low %v4619_v50, %v4626_v19  ;;  %v4077_v45 = vmul.f32 0.5, %v5511_v25  ;;  %v3086_v48 = vpop.f32.mrb[79].mxu0  ;;  %v4186_v51 = vadd.f32 0.5, %v4075_v33  ;;  %v3862_v38 = vmul.f32 0.5, %v3123_v34 }
 0x1c8   : > { %v3127_v49 = vpop.f32.mrb[79].mxu1  ;;  %v3861_v52 = vmul.f32 0.5, %v3084_v39  ;;  %v3863_v58 = vmul.f32 0.5, %v3125_v40  ;;  %5520 = vtanh.f32 %v3860_v47  ;;  %v721_v33 = vrot.slane %v6409_v43, %v6152_v8 }
 0x1c9   : > { %4858 = vst [vmem:[%s6206_s28 + $0x80] sm:$0xff] %v4627_v44  ;;  %v4188_v59 = vadd.f32 0.5, %v4077_v45  ;;  %v4628_v62 = vcombine.low %v4185_v37, %v4186_v51  ;;  %5522 = vtanh.f32 %v3862_v38  ;;  %v713_v37 = vrot.slane %v6409_v43, %v6149_v7 }
 0x1ca   : > { %v5513_v2 = vpop.eup %5512  ;;  %5524 = vtanh.f32 %v3861_v52  ;;  %v717_v40 = vrot.slane %v6409_v43, %v6155_v0  ;;  %v725_v41 = vrot.slane %v6409_v43, %v6158_v13 }
 0x1cb   : > { %v4629_v3 = vcombine.low %v4187_v31, %v4188_v59  ;;  %v5515_v4 = vpop.eup %5514  ;;  %v4636_v6 = vrot.slane %v4628_v62, %v6190_v18  ;;  %v4078_v9 = vmul.f32 0.5, %v5513_v2  ;;  %5526 = vtanh.f32 %v3863_v58  ;;  %v3163_v55 = vpop.f32.mrb[80].mxu0 }
 0x1cc   : > { %v3204_v10 = vpop.f32.mrb[80].mxu1  ;;  %v5517_v12 = vpop.eup %5516  ;;  %v4080_v15 = vmul.f32 0.5, %v5515_v4  ;;  %v3164_v16 = vadd.f32 %v3163_v55, %v697_v60 }
 0x1cd   : > { %v4643_v14 = vrot.slane %v4629_v3, %v6190_v18  ;;  %v3205_v63 = vadd.f32 %v3204_v10, %v705_v61  ;;  %v3165_v17 = vpop.f32.mrb[81].mxu0  ;;  %v3206_v20 = vpop.f32.mrb[81].mxu1  ;;  %v4189_v22 = vadd.f32 0.5, %v4078_v9  ;;  %v4079_v23 = vmul.f32 0.5, %v5517_v12 }
 0x1ce   : > { %v5519_v21 = vpop.eup %5518  ;;  %v3166_v24 = vadd.f32 %v3165_v17, %v701_v1  ;;  %v3207_v26 = vadd.f32 %v3206_v20, %v709_v46  ;;  %v3167_v11 = vpop.f32.mrb[82].mxu0  ;;  %v4191_v28 = vadd.f32 0.5, %v4080_v15  ;;  %v3864_v5 = vmul.f32 0.5, %v3164_v16 }
 0x1cf   : > { %v3208_v50 = vpop.f32.mrb[82].mxu1  ;;  %v4644_v27 = vcombine.low %v4636_v6, %v4643_v14  ;;  %v4081_v29 = vmul.f32 0.5, %v5519_v21  ;;  %v3168_v19 = vpop.f32.mrb[83].mxu0  ;;  %v4190_v32 = vadd.f32 0.5, %v4079_v23  ;;  %v3866_v34 = vmul.f32 0.5, %v3205_v63  ;;  %v6434_v6 = vld [vmem:[%s5844_s30 + $0x58] sm:$0xff] }
 0x1d0   : > { %v3209_v30 = vpop.f32.mrb[83].mxu1  ;;  %v3865_v35 = vmul.f32 0.5, %v3166_v24  ;;  %v3867_v36 = vmul.f32 0.5, %v3207_v26  ;;  %5528 = vtanh.f32 %v3864_v5  ;;  %v737_v23 = vrot.slane %v6434_v6, %v6129_v54 }
 0x1d1   : > { %4859 = vst [vmem:[%s6206_s28 + $0x88] sm:$0xff] %v4644_v27  ;;  %v4192_v25 = vadd.f32 0.5, %v4081_v29  ;;  %v4645_v39 = vcombine.low %v4189_v22, %v4190_v32  ;;  %5530 = vtanh.f32 %v3866_v34  ;;  %v729_v22 = vrot.slane %v6434_v6, %v6126_v53 }
 0x1d2   : > { %v5521_v42 = vpop.eup %5520  ;;  %5532 = vtanh.f32 %v3865_v35  ;;  %v733_v26 = vrot.slane %v6434_v6, %v6133_v56  ;;  %v741_v11 = vrot.slane %v6434_v6, %v6136_v57 }
 0x1d3   : > { %v4646_v44 = vcombine.low %v4191_v28, %v4192_v25  ;;  %v5523_v31 = vpop.eup %5522  ;;  %v4653_v45 = vrot.slane %v4645_v39, %v6190_v18  ;;  %v4082_v47 = vmul.f32 0.5, %v5521_v42  ;;  %5534 = vtanh.f32 %v3867_v36  ;;  %v3245_v48 = vpop.f32.mrb[84].mxu0 }
 0x1d4   : > { %v3286_v49 = vpop.f32.mrb[84].mxu1  ;;  %v5525_v51 = vpop.eup %5524  ;;  %v4084_v52 = vmul.f32 0.5, %v5523_v31  ;;  %v3246_v58 = vadd.f32 %v3245_v48, %v713_v37 }
 0x1d5   : > { %v4660_v38 = vrot.slane %v4646_v44, %v6190_v18  ;;  %v3287_v59 = vadd.f32 %v3286_v49, %v721_v33  ;;  %v3247_v60 = vpop.f32.mrb[85].mxu0  ;;  %v3288_v61 = vpop.f32.mrb[85].mxu1  ;;  %v4193_v62 = vadd.f32 0.5, %v4082_v47  ;;  %v4083_v1 = vmul.f32 0.5, %v5525_v51 }
 0x1d6   : > { %v5527_v43 = vpop.eup %5526  ;;  %v3248_v46 = vadd.f32 %v3247_v60, %v717_v40  ;;  %v3289_v2 = vadd.f32 %v3288_v61, %v725_v41  ;;  %v3249_v3 = vpop.f32.mrb[86].mxu0  ;;  %v4195_v55 = vadd.f32 0.5, %v4084_v52  ;;  %v3868_v12 = vmul.f32 0.5, %v3246_v58 }
 0x1d7   : > { %v3290_v4 = vpop.f32.mrb[86].mxu1  ;;  %v4661_v9 = vcombine.low %v4653_v45, %v4660_v38  ;;  %v4085_v10 = vmul.f32 0.5, %v5527_v43  ;;  %v3250_v14 = vpop.f32.mrb[87].mxu0  ;;  %v4194_v16 = vadd.f32 0.5, %v4083_v1  ;;  %v3870_v63 = vmul.f32 0.5, %v3287_v59 }
 0x1d8   : > { %v3291_v15 = vpop.f32.mrb[87].mxu1  ;;  %v3869_v17 = vmul.f32 0.5, %v3248_v46  ;;  %v3871_v20 = vmul.f32 0.5, %v3289_v2  ;;  %5536 = vtanh.f32 %v3868_v12  ;;  %v753_v1 = vrot.slane %v6434_v6, %v6152_v8 }
 0x1d9   : > { %4860 = vst [vmem:[%s6206_s28 + $0x90] sm:$0xff] %v4661_v9  ;;  %v4196_v21 = vadd.f32 0.5, %v4085_v10  ;;  %v4662_v24 = vcombine.low %v4193_v62, %v4194_v16  ;;  %5538 = vtanh.f32 %v3870_v63  ;;  %v745_v62 = vrot.slane %v6434_v6, %v6149_v7 }
 0x1da   : > { %v5529_v50 = vpop.eup %5528  ;;  %5540 = vtanh.f32 %v3869_v17  ;;  %v749_v2 = vrot.slane %v6434_v6, %v6155_v0  ;;  %v757_v3 = vrot.slane %v6434_v6, %v6158_v13 }
 0x1db   : > { %v4663_v27 = vcombine.low %v4195_v55, %v4196_v21  ;;  %v5531_v28 = vpop.eup %5530  ;;  %v4670_v29 = vrot.slane %v4662_v24, %v6190_v18  ;;  %v4086_v5 = vmul.f32 0.5, %v5529_v50  ;;  %5542 = vtanh.f32 %v3871_v20  ;;  %v3327_v19 = vpop.f32.mrb[88].mxu0 }
 0x1dc   : > { %v3368_v30 = vpop.f32.mrb[88].mxu1  ;;  %v5533_v32 = vpop.eup %5532  ;;  %v4088_v35 = vmul.f32 0.5, %v5531_v28  ;;  %v3328_v36 = vadd.f32 %v3327_v19, %v729_v22 }
 0x1dd   : > { %v4677_v34 = vrot.slane %v4663_v27, %v6190_v18  ;;  %v3369_v25 = vadd.f32 %v3368_v30, %v737_v23  ;;  %v3329_v37 = vpop.f32.mrb[89].mxu0  ;;  %v3370_v33 = vpop.f32.mrb[89].mxu1  ;;  %v4197_v40 = vadd.f32 0.5, %v4086_v5  ;;  %v4087_v41 = vmul.f32 0.5, %v5533_v32 }
 0x1de   : > { %v5535_v39 = vpop.eup %5534  ;;  %v3330_v42 = vadd.f32 %v3329_v37, %v733_v26  ;;  %v3371_v44 = vadd.f32 %v3370_v33, %v741_v11  ;;  %v3331_v31 = vpop.f32.mrb[90].mxu0  ;;  %v4199_v48 = vadd.f32 0.5, %v4088_v35  ;;  %v3872_v51 = vmul.f32 0.5, %v3328_v36 }
 0x1df   : > { %v3372_v45 = vpop.f32.mrb[90].mxu1  ;;  %v4678_v47 = vcombine.low %v4670_v29, %v4677_v34  ;;  %v4089_v49 = vmul.f32 0.5, %v5535_v39  ;;  %v3332_v38 = vpop.f32.mrb[91].mxu0  ;;  %v4198_v58 = vadd.f32 0.5, %v4087_v41  ;;  %v3874_v59 = vmul.f32 0.5, %v3369_v25  ;;  %v6459_v29 = vld [vmem:[%s5844_s30 + $0x60] sm:$0xff] }
 0x1e0   : > { %v3373_v52 = vpop.f32.mrb[91].mxu1  ;;  %v3873_v60 = vmul.f32 0.5, %v3330_v42  ;;  %v3875_v61 = vmul.f32 0.5, %v3371_v44  ;;  %5544 = vtanh.f32 %v3872_v51  ;;  %v769_v41 = vrot.slane %v6459_v29, %v6129_v54 }
 0x1e1   : > { %4861 = vst [vmem:[%s6206_s28 + $0x98] sm:$0xff] %v4678_v47  ;;  %v4200_v43 = vadd.f32 0.5, %v4089_v49  ;;  %v4679_v46 = vcombine.low %v4197_v40, %v4198_v58  ;;  %5546 = vtanh.f32 %v3874_v59  ;;  %v761_v40 = vrot.slane %v6459_v29, %v6126_v53 }
 0x1e2   : > { %v5537_v4 = vpop.eup %5536  ;;  %5548 = vtanh.f32 %v3873_v60  ;;  %v765_v44 = vrot.slane %v6459_v29, %v6133_v56  ;;  %v773_v31 = vrot.slane %v6459_v29, %v6136_v57 }
 0x1e3   : > { %v4680_v9 = vcombine.low %v4199_v48, %v4200_v43  ;;  %v5539_v55 = vpop.eup %5538  ;;  %v4687_v10 = vrot.slane %v4679_v46, %v6190_v18  ;;  %v4090_v12 = vmul.f32 0.5, %v5537_v4  ;;  %5550 = vtanh.f32 %v3875_v61  ;;  %v3409_v14 = vpop.f32.mrb[92].mxu0 }
 0x1e4   : > { %v3450_v15 = vpop.f32.mrb[92].mxu1  ;;  %v5541_v16 = vpop.eup %5540  ;;  %v4092_v17 = vmul.f32 0.5, %v5539_v55  ;;  %v3410_v20 = vadd.f32 %v3409_v14, %v745_v62 }
 0x1e5   : > { %v4694_v63 = vrot.slane %v4680_v9, %v6190_v18  ;;  %v3451_v21 = vadd.f32 %v3450_v15, %v753_v1  ;;  %v3411_v22 = vpop.f32.mrb[93].mxu0  ;;  %v3452_v23 = vpop.f32.mrb[93].mxu1  ;;  %v4201_v24 = vadd.f32 0.5, %v4090_v12  ;;  %v4091_v26 = vmul.f32 0.5, %v5541_v16 }
 0x1e6   : > { %v5543_v6 = vpop.eup %5542  ;;  %v3412_v11 = vadd.f32 %v3411_v22, %v749_v2  ;;  %v3453_v50 = vadd.f32 %v3452_v23, %v757_v3  ;;  %v3413_v27 = vpop.f32.mrb[94].mxu0  ;;  %v4203_v19 = vadd.f32 0.5, %v4092_v17  ;;  %v3876_v32 = vmul.f32 0.5, %v3410_v20 }
 0x1e7   : > { %v3454_v28 = vpop.f32.mrb[94].mxu1  ;;  %v4695_v5 = vcombine.low %v4687_v10, %v4694_v63  ;;  %v4093_v30 = vmul.f32 0.5, %v5543_v6  ;;  %v3414_v34 = vpop.f32.mrb[95].mxu0  ;;  %v4202_v36 = vadd.f32 0.5, %v4091_v26  ;;  %v3878_v25 = vmul.f32 0.5, %v3451_v21 }
 0x1e8   : > { %v3455_v35 = vpop.f32.mrb[95].mxu1  ;;  %v3877_v37 = vmul.f32 0.5, %v3412_v11  ;;  %v3879_v33 = vmul.f32 0.5, %v3453_v50  ;;  %5552 = vtanh.f32 %v3876_v32  ;;  %v785_v26 = vrot.slane %v6459_v29, %v6152_v8 }
 0x1e9   : > { %4862 = vst [vmem:[%s6206_s28 + $0xa0] sm:$0xff] %v4695_v5  ;;  %v4204_v39 = vadd.f32 0.5, %v4093_v30  ;;  %v4696_v42 = vcombine.low %v4201_v24, %v4202_v36  ;;  %5554 = vtanh.f32 %v3878_v25  ;;  %v777_v24 = vrot.slane %v6459_v29, %v6149_v7 }
 0x1ea   : > { %v5545_v45 = vpop.eup %5544  ;;  %5556 = vtanh.f32 %v3877_v37  ;;  %v781_v50 = vrot.slane %v6459_v29, %v6155_v0  ;;  %v789_v27 = vrot.slane %v6459_v29, %v6158_v13 }
 0x1eb   : > { %v4697_v47 = vcombine.low %v4203_v19, %v4204_v39  ;;  %v5547_v48 = vpop.eup %5546  ;;  %v4704_v49 = vrot.slane %v4696_v42, %v6190_v18  ;;  %v4094_v51 = vmul.f32 0.5, %v5545_v45  ;;  %5558 = vtanh.f32 %v3879_v33  ;;  %v3491_v38 = vpop.f32.mrb[96].mxu0 }
 0x1ec   : > { %v3532_v52 = vpop.f32.mrb[96].mxu1  ;;  %v5549_v58 = vpop.eup %5548  ;;  %v4096_v60 = vmul.f32 0.5, %v5547_v48  ;;  %v3492_v61 = vadd.f32 %v3491_v38, %v761_v40  ;;  %v6484_v48 = vld [vmem:[%s5844_s30 + $0x68] sm:$0xff] }
 0x1ed   : > { %v4711_v59 = vrot.slane %v4697_v47, %v6190_v18  ;;  %v3533_v43 = vadd.f32 %v3532_v52, %v769_v41  ;;  %v3493_v62 = vpop.f32.mrb[97].mxu0  ;;  %v3534_v1 = vpop.f32.mrb[97].mxu1  ;;  %v4205_v2 = vadd.f32 0.5, %v4094_v51  ;;  %v4095_v3 = vmul.f32 0.5, %v5549_v58 }
 0x1ee   : > { %v5551_v46 = vpop.eup %5550  ;;  %v3494_v4 = vadd.f32 %v3493_v62, %v765_v44  ;;  %v3535_v9 = vadd.f32 %v3534_v1, %v773_v31  ;;  %v3495_v55 = vpop.f32.mrb[98].mxu0  ;;  %v4207_v14 = vadd.f32 0.5, %v4096_v60  ;;  %v3880_v16 = vmul.f32 0.5, %v3492_v61 }
 0x1ef   : > { %v3536_v10 = vpop.f32.mrb[98].mxu1  ;;  %v4712_v12 = vcombine.low %v4704_v49, %v4711_v59  ;;  %v4097_v15 = vmul.f32 0.5, %v5551_v46  ;;  %v3496_v63 = vpop.f32.mrb[99].mxu0  ;;  %v4206_v20 = vadd.f32 0.5, %v4095_v3  ;;  %v3882_v21 = vmul.f32 0.5, %v3533_v43 }
 0x1f0   : > { %v3537_v17 = vpop.f32.mrb[99].mxu1  ;;  %v3881_v22 = vmul.f32 0.5, %v3494_v4  ;;  %v3883_v23 = vmul.f32 0.5, %v3535_v9  ;;  %5560 = vtanh.f32 %v3880_v16  ;;  %v793_v46 = vrot.slane %v6484_v48, %v6126_v53 }
 0x1f1   : > { %4863 = vst [vmem:[%s6206_s28 + $0xa8] sm:$0xff] %v4712_v12  ;;  %v4208_v6 = vadd.f32 0.5, %v4097_v15  ;;  %v4713_v11 = vcombine.low %v4205_v2, %v4206_v20  ;;  %5562 = vtanh.f32 %v3882_v21  ;;  %v801_v2 = vrot.slane %v6484_v48, %v6129_v54 }
 0x1f2   : > { %v5553_v28 = vpop.eup %5552  ;;  %5564 = vtanh.f32 %v3881_v22  ;;  %v797_v4 = vrot.slane %v6484_v48, %v6133_v56  ;;  %v805_v9 = vrot.slane %v6484_v48, %v6136_v57 }
 0x1f3   : > { %v4714_v5 = vcombine.low %v4207_v14, %v4208_v6  ;;  %v5555_v19 = vpop.eup %5554  ;;  %v4721_v30 = vrot.slane %v4713_v11, %v6190_v18  ;;  %v4098_v32 = vmul.f32 0.5, %v5553_v28  ;;  %5566 = vtanh.f32 %v3883_v23  ;;  %v3573_v34 = vpop.f32.mrb[100].mxu0 }
 0x1f4   : > { %v3614_v35 = vpop.f32.mrb[100].mxu1  ;;  %v5557_v36 = vpop.eup %5556  ;;  %v4100_v37 = vmul.f32 0.5, %v5555_v19  ;;  %v3574_v33 = vadd.f32 %v3573_v34, %v777_v24 }
 0x1f5   : > { %v4728_v25 = vrot.slane %v4714_v5, %v6190_v18  ;;  %v3615_v39 = vadd.f32 %v3614_v35, %v785_v26  ;;  %v3575_v40 = vpop.f32.mrb[101].mxu0  ;;  %v3616_v41 = vpop.f32.mrb[101].mxu1  ;;  %v4209_v29 = vadd.f32 0.5, %v4098_v32  ;;  %v4099_v42 = vmul.f32 0.5, %v5557_v36 }
 0x1f6   : > { %v5559_v13 = vpop.eup %5558  ;;  %v3576_v44 = vadd.f32 %v3575_v40, %v781_v50  ;;  %v3617_v31 = vadd.f32 %v3616_v41, %v789_v27  ;;  %v3577_v45 = vpop.f32.mrb[102].mxu0  ;;  %v4211_v51 = vadd.f32 0.5, %v4100_v37  ;;  %v3884_v52 = vmul.f32 0.5, %v3574_v33 }
 0x1f7   : > { %v3618_v47 = vpop.f32.mrb[102].mxu1  ;;  %v4729_v49 = vcombine.low %v4721_v30, %v4728_v25  ;;  %v4101_v38 = vmul.f32 0.5, %v5559_v13  ;;  %v3578_v58 = vpop.f32.mrb[103].mxu0  ;;  %v4210_v60 = vadd.f32 0.5, %v4099_v42  ;;  %v3886_v61 = vmul.f32 0.5, %v3615_v39 }
 0x1f8   : > { %v3619_v59 = vpop.f32.mrb[103].mxu1  ;;  %v3885_v43 = vmul.f32 0.5, %v3576_v44  ;;  %v3887_v62 = vmul.f32 0.5, %v3617_v31  ;;  %5568 = vtanh.f32 %v3884_v52  ;;  %v809_v33 = vrot.slane %v6484_v48, %v6149_v7 }
 0x1f9   : > { %4864 = vst [vmem:[%s6206_s28 + $0xb0] sm:$0xff] %v4729_v49  ;;  %v4212_v1 = vadd.f32 0.5, %v4101_v38  ;;  %v4730_v3 = vcombine.low %v4209_v29, %v4210_v60  ;;  %5570 = vtanh.f32 %v3886_v61  ;;  %v817_v39 = vrot.slane %v6484_v48, %v6152_v8 }
 0x1fa   : > { %v5561_v55 = vpop.eup %5560  ;;  %5572 = vtanh.f32 %v3885_v43  ;;  %v813_v41 = vrot.slane %v6484_v48, %v6155_v0 }
 0x1fb   : > { %v4731_v10 = vcombine.low %v4211_v51, %v4212_v1  ;;  %v5563_v12 = vpop.eup %5562  ;;  %v4738_v14 = vrot.slane %v4730_v3, %v6190_v18  ;;  %v4102_v15 = vmul.f32 0.5, %v5561_v55  ;;  %5574 = vtanh.f32 %v3887_v62  ;;  %v3655_v53 = vpop.f32.mrb[104].mxu0 }
 0x1fc   : > { %v3696_v16 = vpop.f32.mrb[104].mxu1  ;;  %v5565_v63 = vpop.eup %5564  ;;  %v4104_v17 = vmul.f32 0.5, %v5563_v12  ;;  %v3656_v20 = vadd.f32 %v3655_v53, %v793_v46 }
 0x1fd   : > { %v4745_v54 = vrot.slane %v4731_v10, %v6190_v18  ;;  %v3697_v21 = vadd.f32 %v3696_v16, %v801_v2  ;;  %v3657_v56 = vpop.f32.mrb[105].mxu0  ;;  %v3698_v22 = vpop.f32.mrb[105].mxu1  ;;  %v4213_v57 = vadd.f32 0.5, %v4102_v15  ;;  %v4103_v6 = vmul.f32 0.5, %v5565_v63 }
 0x1fe   : > { %v5567_v23 = vpop.eup %5566  ;;  %v3658_v24 = vadd.f32 %v3657_v56, %v797_v4  ;;  %v3699_v26 = vadd.f32 %v3698_v22, %v805_v9  ;;  %v3659_v11 = vpop.f32.mrb[106].mxu0  ;;  %v4215_v28 = vadd.f32 0.5, %v4104_v17  ;;  %v3888_v19 = vmul.f32 0.5, %v3656_v20 }
 0x1ff   : > { %v3700_v50 = vpop.f32.mrb[106].mxu1  ;;  %v4746_v27 = vcombine.low %v4738_v14, %v4745_v54  ;;  %v4105_v5 = vmul.f32 0.5, %v5567_v23  ;;  %v3660_v30 = vpop.f32.mrb[107].mxu0  ;;  %v4214_v34 = vadd.f32 0.5, %v4103_v6  ;;  %v3890_v35 = vmul.f32 0.5, %v3697_v21 }
 0x200   : > { %v3701_v32 = vpop.f32.mrb[107].mxu1  ;;  %v3889_v36 = vmul.f32 0.5, %v3658_v24  ;;  %v3891_v25 = vmul.f32 0.5, %v3699_v26  ;;  %5576 = vtanh.f32 %v3888_v19 }
 0x201   : > { %4865 = vst [vmem:[%s6206_s28 + $0xb8] sm:$0xff] %v4746_v27  ;;  %v4216_v37 = vadd.f32 0.5, %v4105_v5  ;;  %v4747_v40 = vcombine.low %v4213_v57, %v4214_v34  ;;  %5578 = vtanh.f32 %v3890_v35 }
 0x202   : > { %v5569_v13 = vpop.eup %5568  ;;  %5580 = vtanh.f32 %v3889_v36 }
 0x203   : > { %v4748_v29 = vcombine.low %v4215_v28, %v4216_v37  ;;  %v5571_v42 = vpop.eup %5570  ;;  %v4755_v44 = vrot.slane %v4747_v40, %v6190_v18  ;;  %v4106_v31 = vmul.f32 0.5, %v5569_v13  ;;  %5582 = vtanh.f32 %v3891_v25  ;;  %v3737_v45 = vpop.f32.mrb[108].mxu0 }
 0x204   : > { %v3778_v47 = vpop.f32.mrb[108].mxu1  ;;  %v5573_v49 = vpop.eup %5572  ;;  %v4108_v51 = vmul.f32 0.5, %v5571_v42  ;;  %v3738_v8 = vadd.f32 %v3737_v45, %v809_v33 }
 0x205   : > { %v4762_v7 = vrot.slane %v4748_v29, %v6190_v18  ;;  %v3739_v38 = vpop.f32.mrb[109].mxu0  ;;  %v3779_v52 = vadd.f32 %v3778_v47, %v817_v39  ;;  %v5145_v58 = vpop.f32.mrb[109].mxu1  ;;  %v4217_v48 = vadd.f32 0.5, %v4106_v31  ;;  %v4107_v59 = vmul.f32 0.5, %v5573_v49 }
 0x206   : > { %v5575_v0 = vpop.eup %5574  ;;  %v3740_v60 = vadd.f32 %v3739_v38, %v813_v41  ;;  %v3741_v61 = vpop.f32.mrb[110].mxu0  ;;  %v4219_v1 = vadd.f32 0.5, %v4108_v51  ;;  %v3892_v2 = vmul.f32 0.5, %v3738_v8 }
 0x207   : > { %v3781_v43 = vpop.f32.mrb[110].mxu1  ;;  %v4763_v62 = vcombine.low %v4755_v44, %v4762_v7  ;;  %v4109_v46 = vmul.f32 0.5, %v5575_v0  ;;  %v3742_v3 = vpop.f32.mrb[111].mxu0  ;;  %v4218_v9 = vadd.f32 0.5, %v4107_v59  ;;  %v3894_v10 = vmul.f32 0.5, %v3779_v52 }
 0x208   : > { %v5146_v4 = vpop.f32.mrb[111].mxu1  ;;  %v3893_v55 = vmul.f32 0.5, %v3740_v60  ;;  %5584 = vtanh.f32 %v3892_v2 }
 0x209   : > { %4866 = vst [vmem:[%s6206_s28 + $0xc0] sm:$0xff] %v4763_v62  ;;  %v4220_v12 = vadd.f32 0.5, %v4109_v46  ;;  %v4764_v14 = vcombine.low %v4217_v48, %v4218_v9 }
 0x20a   : > { %5586 = vtanh.f32 %v3893_v55  ;;  %v5577_v15 = vpop.eup %5576 }
 0x20b   : > { %v4765_v53 = vcombine.low %v4219_v1, %v4220_v12  ;;  %5588 = vtanh.f32 %v3894_v10  ;;  %v5579_v16 = vpop.eup %5578  ;;  %v4772_v63 = vrot.slane %v4764_v14, %v6190_v18  ;;  %v4110_v54 = vmul.f32 0.5, %v5577_v15 }
 0x20c   : > { %v5581_v17 = vpop.eup %5580  ;;  %v4112_v21 = vmul.f32 0.5, %v5579_v16 }
 0x20d   : > { %v4779_v20 = vrot.slane %v4765_v53, %v6190_v18  ;;  %v5583_v56 = vpop.eup %5582  ;;  %v4221_v22 = vadd.f32 0.5, %v4110_v54  ;;  %v4111_v23 = vmul.f32 0.5, %v5581_v17 }
 0x20e   : > { %v4223_v6 = vadd.f32 0.5, %v4112_v21  ;;  %v4113_v24 = vmul.f32 0.5, %v5583_v56 }
 0x20f   : > { %v4780_v57 = vcombine.low %v4772_v63, %v4779_v20  ;;  %v4222_v26 = vadd.f32 0.5, %v4111_v23 }
 0x210   : > { %v4224_v11 = vadd.f32 0.5, %v4113_v24 }
 0x211   : > { %4867 = vst [vmem:[%s6206_s28 + $0xc8] sm:$0xff] %v4780_v57  ;;  %v4781_v50 = vcombine.low %v4221_v22, %v4222_v26 }
 0x212   : > { %v5585_v27 = vpop.eup %5584  ;;  %v4782_v28 = vcombine.low %v4223_v6, %v4224_v11 }
 0x213   : > { %v4789_v19 = vrot.slane %v4781_v50, %v6190_v18  ;;  %v4114_v30 = vmul.f32 0.5, %v5585_v27 }
 0x214   : > { %v5587_v5 = vpop.eup %5586  ;;  %v4796_v34 = vrot.slane %v4782_v28, %v6190_v18 }
 0x215   : > { %v5589_v32 = vpop.eup %5588  ;;  %v4115_v35 = vmul.f32 0.5, %v5587_v5  ;;  %v4225_v36 = vadd.f32 0.5, %v4114_v30 }
 0x216   : > { %v4116_v25 = vmul.f32 0.5, %v5589_v32  ;;  %v4797_v37 = vcombine.low %v4789_v19, %v4796_v34 }
 0x217   : > { %v4226_v33 = vadd.f32 0.5, %v4115_v35 }
 0x218   : > { %v4227_v39 = vadd.f32 0.5, %v4116_v25  ;;  %4868 = vst [vmem:[%s6206_s28 + $0xd0] sm:$0xff] %v4797_v37 }
 0x219   : > { %v4798_v40 = vcombine.low %v4225_v36, %v4226_v33 }
 0x21a   : > { %v4812_v41 = vrot.slane %v4227_v39, %v6190_v18 }
 0x21b   : > { %v4805_v13 = vrot.slane %v4798_v40, %v6190_v18 }
 0x21d   : > { %v4813_v29 = vcombine.low %v4805_v13, %v4812_v41 }
 0x21f   : > { %4869 = vst [vmem:[%s6206_s28 + $0xd8] sm:$0x3f] %v4813_v29 }
 0x220 PF: > { %p16_p8 = scmp.ge.s32.totalorder %s5739_s17, 4   ;;  %s6539_s12 = smov %s5680_s13 }
 0x221   : > { %s6540_s13 = smov %s5684_s14  ;;  %s6541_s14 = smov %s5749_s20 }
 0x222   : > { %s6542_s15 = smov %s5739_s17  ;;  %18 = sbr.rel (!%p16_p8) target bundleno = 5 (0x5), region = 85 }
 0x229   :  { %4892 = vsyncpa [#allocation3], 1 }
 0x22a   :  { %4894 = vsyncpa [#allocation3 + $0x1], 1 }
 0x22b   :  { %4895 = vsyncpa [#allocation5], 1 }
 0x22c   :  { %4897 = vsyncpa [#allocation5 + $0x1], 1 }

</bundles_post_ra>
